<compile_context>
chip_gen: v6e
topology: v6e:2x2x1
jax: 0.10.0
libtpu: 0.0.40
codegen_flags: <defaults>
</compile_context>

<pallas_src>
import functools

import jax
import jax.numpy as jnp
from jax.experimental import pallas as pl
from jax.experimental.pallas import tpu as pltpu


# ---------------------------------------------------------------------------
# Fused RDB kernel (one image per grid step).
# ---------------------------------------------------------------------------
def _rdb_kernel(xp_ref, mask_ref, wd_ref, bd_ref, wf_ref, bf_ref, o_ref,
                feat_ref, *, input_dim, G, C, H, W):
    # Shapes (per grid step):
    #   xp_ref  : (1, input_dim, PF)  padded + spatially-flattened input (f32)
    #   mask_ref: (1, L)              1.0 on real-pixel columns, 0.0 on halo cols
    #   wd_ref  : (C, G, 9*CT)        dense conv weights, im2col row order, bf16
    #   bd_ref  : (C, G, 1)           dense conv biases (f32)
    #   wf_ref  : (G, CT)             1x1 fuse conv weights, bf16
    #   bf_ref  : (G, 1)              fuse bias (f32)
    #   o_ref   : (1, G, L)           output in flat q-layout
    #   feat_ref: (CT, PF)            VMEM scratch: padded dense feature map (f32)
    # with CT = input_dim + G*C, Wp = W+2, L = H*Wp, PF = (H+2)*Wp + 2.
    CT = input_dim + G * C
    Wp = W + 2
    L = H * Wp
    ctr = Wp + 1                       # flat offset of the center tap (ky=kx=1)
    mxu_dtype = wd_ref.dtype

    # Zero-init scratch (zero spatial halo AND zero not-yet-computed channels,
    # which pair with zero-padded weight rows), then drop the input in.
    feat_ref[...] = jnp.zeros_like(feat_ref)
    feat_ref[0:input_dim, :] = xp_ref[0]

    mask = mask_ref[...]                               # (1, L)  f32
    x_center = xp_ref[0, :, ctr:ctr + L]               # (input_dim, L) f32

    centers = [x_center]                               # unshifted features, f32
    for i in range(C):
        # im2col RHS: 9 lane-offset slices of the flat padded feature map.
        taps = []
        for ky in range(3):
            for kx in range(3):
                d = ky * Wp + kx
                taps.append(feat_ref[:, d:d + L])       # (CT, L)
        rhs = jnp.concatenate(taps, axis=0).astype(mxu_dtype)   # (9*CT, L)
        y = jnp.dot(wd_ref[i], rhs,
                    preferred_element_type=jnp.float32)         # (G, L) f32
        h = jnp.maximum(y + bd_ref[i], 0.0) * mask               # ReLU + halo mask
        centers.append(h)
        if i + 1 < C:
            # Make the new G channels (with correct zero halo) visible to the
            # next layer's shifted-tap reads.
            feat_ref[input_dim + G * i:input_dim + G * (i + 1),
                     ctr:ctr + L] = h

    # 1x1 fuse conv over the dense concat, then residual add with the input.
    dense = jnp.concatenate(centers, axis=0).astype(mxu_dtype)   # (CT, L)
    yf = jnp.dot(wf_ref[...], dense,
                 preferred_element_type=jnp.float32) + bf_ref[...]
    out = x_center + yf                                # requires input_dim == G
    o_ref[0] = out.astype(o_ref.dtype)


# ---------------------------------------------------------------------------
# Wrapper: weight repacking, padding/flattening, pallas_call.
# ---------------------------------------------------------------------------
def _prep_weights(params, input_dim, G, C, mxu_dtype):
    CT = input_dim + G * C
    wd, bd = [], []
    for (w, b) in params["dense"]:            # w: (G, cin, 3, 3) OIHW, b: (G,)
        cin = w.shape[1]
        wp = jnp.pad(w, ((0, 0), (0, CT - cin), (0, 0), (0, 0)))  # (G, CT, 3, 3)
        # column index = (ky*3 + kx)*CT + c  -> matches the kernel's tap order.
        wd.append(jnp.transpose(wp, (0, 2, 3, 1)).reshape(G, 9 * CT))
        bd.append(b.reshape(G, 1))
    wd = jnp.stack(wd, axis=0).astype(mxu_dtype)        # (C, G, 9*CT)
    bd = jnp.stack(bd, axis=0)                          # (C, G, 1)  f32
    fw, fb = params["fuse"]                             # (G, CT, 1, 1), (G,)
    wf = fw.reshape(G, CT).astype(mxu_dtype)            # (G, CT)
    bf = fb.reshape(G, 1)                               # (G, 1)     f32
    return wd, bd, wf, bf


def rdb_forward_nchw(x_nchw, params, mxu_dtype=jnp.bfloat16):
    """RDB forward. Input/output NCHW (PyTorch convention)."""
    N, input_dim, H, W = x_nchw.shape
    C = len(params["dense"])
    G = params["dense"][0][0].shape[0]
    assert input_dim == G, "RDB residual add requires input_dim == G"
    CT = input_dim + G * C
    Wp = W + 2
    L = H * Wp                         # flat q-extent computed per image
    PF = (H + 2) * Wp + 2              # padded + flattened spatial extent

    wd, bd, wf, bf = _prep_weights(params, input_dim, G, C, mxu_dtype)

    # Pad the original input once (zero spatial halo) and flatten spatially.
    xp = jnp.pad(x_nchw, ((0, 0), (0, 0), (1, 1), (1, 1)))
    xp = xp.reshape(N, input_dim, (H + 2) * Wp)
    xp = jnp.pad(xp, ((0, 0), (0, 0), (0, 2)))          # -> (N, input_dim, PF)

    # Valid-column mask in flat q coords (q = y*(W+2) + x; only x < W is real).
    cols = jnp.arange(L, dtype=jnp.int32) % Wp
    mask = (cols < W).astype(jnp.float32).reshape(1, L)

    kernel = functools.partial(_rdb_kernel, input_dim=input_dim, G=G, C=C,
                               H=H, W=W)
    out_flat = pl.pallas_call(
        kernel,
        out_shape=jax.ShapeDtypeStruct((N, G, L), x_nchw.dtype),
        grid_spec=pltpu.PrefetchScalarGridSpec(
            num_scalar_prefetch=0,
            grid=(N,),
            in_specs=[
                pl.BlockSpec((1, input_dim, PF), lambda n: (n, 0, 0)),
                pl.BlockSpec((1, L), lambda n: (0, 0)),
                pl.BlockSpec((C, G, 9 * CT), lambda n: (0, 0, 0)),
                pl.BlockSpec((C, G, 1), lambda n: (0, 0, 0)),
                pl.BlockSpec((G, CT), lambda n: (0, 0)),
                pl.BlockSpec((G, 1), lambda n: (0, 0)),
            ],
            out_specs=pl.BlockSpec((1, G, L), lambda n: (n, 0, 0)),
            scratch_shapes=[pltpu.VMEM((CT, PF), jnp.float32)],
        ),
        compiler_params=pltpu.CompilerParams(
            dimension_semantics=("parallel",)),
    )(xp, mask, wd, bd, wf, bf)

    # Drop the 2 halo columns per row and un-flatten (free reshape + tiny slice).
    return out_flat.reshape(N, G, H, Wp)[:, :, :, :W]


# ---------------------------------------------------------------------------
# Parameter init (PyTorch OIHW convention) + pure-JAX reference.
# ---------------------------------------------------------------------------
def init_rdb_params(key, input_dim, G, C):
    params = {"dense": [], "fuse": None}
    for i in range(C):
        cin = input_dim + G * i
        key, kw, kb = jax.random.split(key, 3)
        w = jax.random.normal(kw, (G, cin, 3, 3), jnp.float32) * 0.1
        b = jax.random.normal(kb, (G,), jnp.float32) * 0.1
        params["dense"].append((w, b))
    cin = input_dim + G * C
    key, kw, kb = jax.random.split(key, 3)
    fw = jax.random.normal(kw, (G, cin, 1, 1), jnp.float32) * 0.1
    fb = jax.random.normal(kb, (G,), jnp.float32) * 0.1
    params["fuse"] = (fw, fb)
    return params


def rdb_reference_nchw(x_nchw, params, mxu_dtype=jnp.bfloat16):
    """Pure-JAX reference (lax.conv, NCHW/OIHW) with matching bf16 MXU operands."""
    dn = ("NCHW", "OIHW", "NCHW")
    out = x_nchw
    for (w, b) in params["dense"]:
        h = jax.lax.conv_general_dilated(
            out.astype(mxu_dtype), w.astype(mxu_dtype), (1, 1), "SAME",
            dimension_numbers=dn, preferred_element_type=jnp.float32)
        h = h + b.reshape(1, -1, 1, 1)
        out = jnp.concatenate([out, jnp.maximum(h, 0.0)], axis=1)
    fw, fb = params["fuse"]
    y = jax.lax.conv_general_dilated(
        out.astype(mxu_dtype), fw.astype(mxu_dtype), (1, 1), "SAME",
        dimension_numbers=dn, preferred_element_type=jnp.float32)
    y = y + fb.reshape(1, -1, 1, 1)
    return x_nchw + y


if __name__ == "__main__":
    # RDB(input_dim=G=4, G=4, C=3) on a small NCHW input.
    input_dim, G, C = 4, 4, 3
    N, H, W = 2, 16, 16

    key = jax.random.PRNGKey(0)
    key, kx = jax.random.split(key)
    x = jax.random.normal(kx, (N, input_dim, H, W), jnp.float32)
    params = init_rdb_params(key, input_dim, G, C)

    out = jax.block_until_ready(rdb_forward_nchw(x, params))
    ref = jax.block_until_ready(rdb_reference_nchw(x, params))

    assert out.shape == (N, G, H, W)
    assert jnp.allclose(out, ref, rtol=1e-3, atol=1e-3), \
        "mismatch vs reference: max abs err = %e" % float(jnp.max(jnp.abs(out - ref)))
    print("KERNEL_OK")
</pallas_src>

<mosaic_0001>
module attributes {stable_mosaic.version = 11 : i64} {
  func.func @_rdb_kernel(%arg0: i32, %arg1: memref<1x4x326xf32, #tpu.memory_space<vmem>>, %arg2: memref<1x288xf32, #tpu.memory_space<vmem>>, %arg3: memref<3x4x144xbf16, #tpu.memory_space<vmem>>, %arg4: memref<3x4x1xf32, #tpu.memory_space<vmem>>, %arg5: memref<4x16xbf16, #tpu.memory_space<vmem>>, %arg6: memref<4x1xf32, #tpu.memory_space<vmem>>, %arg7: memref<1x4x288xf32, #tpu.memory_space<vmem>>, %arg8: memref<16x326xf32, #tpu.memory_space<vmem>>) attributes {dimension_semantics = [#tpu.dimension_semantics<parallel>], iteration_bounds = array<i64: 2>, scalar_prefetch = 0 : i64, scratch_operands = 1 : i64, tpu.core_type = #tpu.core_type<tc>, window_params = [{transform_indices = @transform_0, window_bounds = array<i64: 1, 4, 326>}, {pipeline_mode = #tpu.pipeline_mode<synchronous>, transform_indices = @transform_1, window_bounds = array<i64: 1, 288>}, {pipeline_mode = #tpu.pipeline_mode<synchronous>, transform_indices = @transform_2, window_bounds = array<i64: 3, 4, 144>}, {pipeline_mode = #tpu.pipeline_mode<synchronous>, transform_indices = @transform_3, window_bounds = array<i64: 3, 4, 1>}, {pipeline_mode = #tpu.pipeline_mode<synchronous>, transform_indices = @transform_4, window_bounds = array<i64: 4, 16>}, {pipeline_mode = #tpu.pipeline_mode<synchronous>, transform_indices = @transform_5, window_bounds = array<i64: 4, 1>}, {transform_indices = @transform_6, window_bounds = array<i64: 1, 4, 288>}]} {
    %cst = arith.constant 0.000000e+00 : f32
    %0 = vector.broadcast %cst : f32 to vector<16x326xf32>
    %c0 = arith.constant 0 : index
    %c0_0 = arith.constant 0 : index
    %1 = vector.load %arg8[%c0, %c0_0] : memref<16x326xf32, #tpu.memory_space<vmem>>, vector<16x326xf32>
    tpu.vector_store %arg8[%c0, %c0_0], %0 {strides = array<i32>} : memref<16x326xf32, #tpu.memory_space<vmem>>, vector<16x326xf32>,
    %c0_1 = arith.constant 0 : index
    %c0_2 = arith.constant 0 : index
    %c0_3 = arith.constant 0 : index
    %2 = vector.load %arg1[%c0_1, %c0_2, %c0_3] : memref<1x4x326xf32, #tpu.memory_space<vmem>>, vector<1x4x326xf32>
    %3 = vector.shape_cast %2 : vector<1x4x326xf32> to vector<4x326xf32>
    %c0_4 = arith.constant 0 : index
    %c0_5 = arith.constant 0 : index
    %4 = vector.load %arg8[%c0_4, %c0_5] : memref<16x326xf32, #tpu.memory_space<vmem>>, vector<4x326xf32>
    tpu.vector_store %arg8[%c0_4, %c0_5], %3 {strides = array<i32>} : memref<16x326xf32, #tpu.memory_space<vmem>>, vector<4x326xf32>,
    %c0_6 = arith.constant 0 : index
    %c0_7 = arith.constant 0 : index
    %5 = vector.load %arg2[%c0_6, %c0_7] : memref<1x288xf32, #tpu.memory_space<vmem>>, vector<1x288xf32>
    %c0_8 = arith.constant 0 : index
    %c0_9 = arith.constant 0 : index
    %c19 = arith.constant 19 : index
    %6 = vector.load %arg1[%c0_8, %c0_9, %c19] : memref<1x4x326xf32, #tpu.memory_space<vmem>>, vector<1x4x288xf32>
    %7 = vector.shape_cast %6 : vector<1x4x288xf32> to vector<4x288xf32>
    %c0_10 = arith.constant 0 : index
    %c0_11 = arith.constant 0 : index
    %8 = vector.load %arg8[%c0_10, %c0_11] : memref<16x326xf32, #tpu.memory_space<vmem>>, vector<16x288xf32>
    %c0_12 = arith.constant 0 : index
    %c1 = arith.constant 1 : index
    %9 = vector.load %arg8[%c0_12, %c1] : memref<16x326xf32, #tpu.memory_space<vmem>>, vector<16x288xf32>
    %c0_13 = arith.constant 0 : index
    %c2 = arith.constant 2 : index
    %10 = vector.load %arg8[%c0_13, %c2] : memref<16x326xf32, #tpu.memory_space<vmem>>, vector<16x288xf32>
    %c0_14 = arith.constant 0 : index
    %c18 = arith.constant 18 : index
    %11 = vector.load %arg8[%c0_14, %c18] : memref<16x326xf32, #tpu.memory_space<vmem>>, vector<16x288xf32>
    %c0_15 = arith.constant 0 : index
    %c19_16 = arith.constant 19 : index
    %12 = vector.load %arg8[%c0_15, %c19_16] : memref<16x326xf32, #tpu.memory_space<vmem>>, vector<16x288xf32>
    %c0_17 = arith.constant 0 : index
    %c20 = arith.constant 20 : index
    %13 = vector.load %arg8[%c0_17, %c20] : memref<16x326xf32, #tpu.memory_space<vmem>>, vector<16x288xf32>
    %c0_18 = arith.constant 0 : index
    %c36 = arith.constant 36 : index
    %14 = vector.load %arg8[%c0_18, %c36] : memref<16x326xf32, #tpu.memory_space<vmem>>, vector<16x288xf32>
    %c0_19 = arith.constant 0 : index
    %c37 = arith.constant 37 : index
    %15 = vector.load %arg8[%c0_19, %c37] : memref<16x326xf32, #tpu.memory_space<vmem>>, vector<16x288xf32>
    %c0_20 = arith.constant 0 : index
    %c38 = arith.constant 38 : index
    %16 = vector.load %arg8[%c0_20, %c38] : memref<16x326xf32, #tpu.memory_space<vmem>>, vector<16x288xf32>
    %17 = tpu.concatenate %8, %9, %10, %11, %12, %13, %14, %15, %16 in 0 : vector<16x288xf32>, vector<16x288xf32>, vector<16x288xf32>, vector<16x288xf32>, vector<16x288xf32>, vector<16x288xf32>, vector<16x288xf32>, vector<16x288xf32>, vector<16x288xf32> -> vector<144x288xf32>
    %18 = arith.truncf %17 : vector<144x288xf32> to vector<144x288xbf16>
    %c0_21 = arith.constant 0 : index
    %c0_22 = arith.constant 0 : index
    %c0_23 = arith.constant 0 : index
    %19 = vector.load %arg3[%c0_21, %c0_22, %c0_23] : memref<3x4x144xbf16, #tpu.memory_space<vmem>>, vector<1x4x144xbf16>
    %20 = vector.shape_cast %19 : vector<1x4x144xbf16> to vector<4x144xbf16>
    %cst_24 = arith.constant dense<0.000000e+00> : vector<4x288xf32>
    %21 = tpu.matmul %20, %18, %cst_24 {dimension_numbers = #tpu.dot_dimension_numbers<[1], [0], [0], [1], [0, 0, 1, 1], [], []>} : vector<4x144xbf16>, vector<144x288xbf16>, vector<4x288xf32> -> vector<4x288xf32>
    %c0_25 = arith.constant 0 : index
    %c0_26 = arith.constant 0 : index
    %c0_27 = arith.constant 0 : index
    %22 = vector.load %arg4[%c0_25, %c0_26, %c0_27] : memref<3x4x1xf32, #tpu.memory_space<vmem>>, vector<1x4x1xf32>
    %23 = vector.shape_cast %22 : vector<1x4x1xf32> to vector<4x1xf32>
    %24 = vector.broadcast %23 : vector<4x1xf32> to vector<4x288xf32>
    %25 = arith.addf %21, %24 : vector<4x288xf32>
    %cst_28 = arith.constant 0.000000e+00 : f32
    %26 = vector.broadcast %cst_28 : f32 to vector<4x288xf32>
    %27 = arith.maximumf %25, %26 : vector<4x288xf32>
    %28 = vector.broadcast %5 : vector<1x288xf32> to vector<4x288xf32>
    %29 = arith.mulf %27, %28 : vector<4x288xf32>
    %c4 = arith.constant 4 : index
    %c19_29 = arith.constant 19 : index
    %30 = vector.load %arg8[%c4, %c19_29] : memref<16x326xf32, #tpu.memory_space<vmem>>, vector<4x288xf32>
    tpu.vector_store %arg8[%c4, %c19_29], %29 {strides = array<i32>} : memref<16x326xf32, #tpu.memory_space<vmem>>, vector<4x288xf32>,
    %c0_30 = arith.constant 0 : index
    %c0_31 = arith.constant 0 : index
    %31 = vector.load %arg8[%c0_30, %c0_31] : memref<16x326xf32, #tpu.memory_space<vmem>>, vector<16x288xf32>
    %c0_32 = arith.constant 0 : index
    %c1_33 = arith.constant 1 : index
    %32 = vector.load %arg8[%c0_32, %c1_33] : memref<16x326xf32, #tpu.memory_space<vmem>>, vector<16x288xf32>
    %c0_34 = arith.constant 0 : index
    %c2_35 = arith.constant 2 : index
    %33 = vector.load %arg8[%c0_34, %c2_35] : memref<16x326xf32, #tpu.memory_space<vmem>>, vector<16x288xf32>
    %c0_36 = arith.constant 0 : index
    %c18_37 = arith.constant 18 : index
    %34 = vector.load %arg8[%c0_36, %c18_37] : memref<16x326xf32, #tpu.memory_space<vmem>>, vector<16x288xf32>
    %c0_38 = arith.constant 0 : index
    %c19_39 = arith.constant 19 : index
    %35 = vector.load %arg8[%c0_38, %c19_39] : memref<16x326xf32, #tpu.memory_space<vmem>>, vector<16x288xf32>
    %c0_40 = arith.constant 0 : index
    %c20_41 = arith.constant 20 : index
    %36 = vector.load %arg8[%c0_40, %c20_41] : memref<16x326xf32, #tpu.memory_space<vmem>>, vector<16x288xf32>
    %c0_42 = arith.constant 0 : index
    %c36_43 = arith.constant 36 : index
    %37 = vector.load %arg8[%c0_42, %c36_43] : memref<16x326xf32, #tpu.memory_space<vmem>>, vector<16x288xf32>
    %c0_44 = arith.constant 0 : index
    %c37_45 = arith.constant 37 : index
    %38 = vector.load %arg8[%c0_44, %c37_45] : memref<16x326xf32, #tpu.memory_space<vmem>>, vector<16x288xf32>
    %c0_46 = arith.constant 0 : index
    %c38_47 = arith.constant 38 : index
    %39 = vector.load %arg8[%c0_46, %c38_47] : memref<16x326xf32, #tpu.memory_space<vmem>>, vector<16x288xf32>
    %40 = tpu.concatenate %31, %32, %33, %34, %35, %36, %37, %38, %39 in 0 : vector<16x288xf32>, vector<16x288xf32>, vector<16x288xf32>, vector<16x288xf32>, vector<16x288xf32>, vector<16x288xf32>, vector<16x288xf32>, vector<16x288xf32>, vector<16x288xf32> -> vector<144x288xf32>
    %41 = arith.truncf %40 : vector<144x288xf32> to vector<144x288xbf16>
    %c1_48 = arith.constant 1 : index
    %c0_49 = arith.constant 0 : index
    %c0_50 = arith.constant 0 : index
    %42 = vector.load %arg3[%c1_48, %c0_49, %c0_50] : memref<3x4x144xbf16, #tpu.memory_space<vmem>>, vector<1x4x144xbf16>
    %43 = vector.shape_cast %42 : vector<1x4x144xbf16> to vector<4x144xbf16>
    %cst_51 = arith.constant dense<0.000000e+00> : vector<4x288xf32>
    %44 = tpu.matmul %43, %41, %cst_51 {dimension_numbers = #tpu.dot_dimension_numbers<[1], [0], [0], [1], [0, 0, 1, 1], [], []>} : vector<4x144xbf16>, vector<144x288xbf16>, vector<4x288xf32> -> vector<4x288xf32>
    %c1_52 = arith.constant 1 : index
    %c0_53 = arith.constant 0 : index
    %c0_54 = arith.constant 0 : index
    %45 = vector.load %arg4[%c1_52, %c0_53, %c0_54] : memref<3x4x1xf32, #tpu.memory_space<vmem>>, vector<1x4x1xf32>
    %46 = vector.shape_cast %45 : vector<1x4x1xf32> to vector<4x1xf32>
    %47 = vector.broadcast %46 : vector<4x1xf32> to vector<4x288xf32>
    %48 = arith.addf %44, %47 : vector<4x288xf32>
    %cst_55 = arith.constant 0.000000e+00 : f32
    %49 = vector.broadcast %cst_55 : f32 to vector<4x288xf32>
    %50 = arith.maximumf %48, %49 : vector<4x288xf32>
    %51 = vector.broadcast %5 : vector<1x288xf32> to vector<4x288xf32>
    %52 = arith.mulf %50, %51 : vector<4x288xf32>
    %c8 = arith.constant 8 : index
    %c19_56 = arith.constant 19 : index
    %53 = vector.load %arg8[%c8, %c19_56] : memref<16x326xf32, #tpu.memory_space<vmem>>, vector<4x288xf32>
    tpu.vector_store %arg8[%c8, %c19_56], %52 {strides = array<i32>} : memref<16x326xf32, #tpu.memory_space<vmem>>, vector<4x288xf32>,
    %c0_57 = arith.constant 0 : index
    %c0_58 = arith.constant 0 : index
    %54 = vector.load %arg8[%c0_57, %c0_58] : memref<16x326xf32, #tpu.memory_space<vmem>>, vector<16x288xf32>
    %c0_59 = arith.constant 0 : index
    %c1_60 = arith.constant 1 : index
    %55 = vector.load %arg8[%c0_59, %c1_60] : memref<16x326xf32, #tpu.memory_space<vmem>>, vector<16x288xf32>
    %c0_61 = arith.constant 0 : index
    %c2_62 = arith.constant 2 : index
    %56 = vector.load %arg8[%c0_61, %c2_62] : memref<16x326xf32, #tpu.memory_space<vmem>>, vector<16x288xf32>
    %c0_63 = arith.constant 0 : index
    %c18_64 = arith.constant 18 : index
    %57 = vector.load %arg8[%c0_63, %c18_64] : memref<16x326xf32, #tpu.memory_space<vmem>>, vector<16x288xf32>
    %c0_65 = arith.constant 0 : index
    %c19_66 = arith.constant 19 : index
    %58 = vector.load %arg8[%c0_65, %c19_66] : memref<16x326xf32, #tpu.memory_space<vmem>>, vector<16x288xf32>
    %c0_67 = arith.constant 0 : index
    %c20_68 = arith.constant 20 : index
    %59 = vector.load %arg8[%c0_67, %c20_68] : memref<16x326xf32, #tpu.memory_space<vmem>>, vector<16x288xf32>
    %c0_69 = arith.constant 0 : index
    %c36_70 = arith.constant 36 : index
    %60 = vector.load %arg8[%c0_69, %c36_70] : memref<16x326xf32, #tpu.memory_space<vmem>>, vector<16x288xf32>
    %c0_71 = arith.constant 0 : index
    %c37_72 = arith.constant 37 : index
    %61 = vector.load %arg8[%c0_71, %c37_72] : memref<16x326xf32, #tpu.memory_space<vmem>>, vector<16x288xf32>
    %c0_73 = arith.constant 0 : index
    %c38_74 = arith.constant 38 : index
    %62 = vector.load %arg8[%c0_73, %c38_74] : memref<16x326xf32, #tpu.memory_space<vmem>>, vector<16x288xf32>
    %63 = tpu.concatenate %54, %55, %56, %57, %58, %59, %60, %61, %62 in 0 : vector<16x288xf32>, vector<16x288xf32>, vector<16x288xf32>, vector<16x288xf32>, vector<16x288xf32>, vector<16x288xf32>, vector<16x288xf32>, vector<16x288xf32>, vector<16x288xf32> -> vector<144x288xf32>
    %64 = arith.truncf %63 : vector<144x288xf32> to vector<144x288xbf16>
    %c2_75 = arith.constant 2 : index
    %c0_76 = arith.constant 0 : index
    %c0_77 = arith.constant 0 : index
    %65 = vector.load %arg3[%c2_75, %c0_76, %c0_77] : memref<3x4x144xbf16, #tpu.memory_space<vmem>>, vector<1x4x144xbf16>
    %66 = vector.shape_cast %65 : vector<1x4x144xbf16> to vector<4x144xbf16>
    %cst_78 = arith.constant dense<0.000000e+00> : vector<4x288xf32>
    %67 = tpu.matmul %66, %64, %cst_78 {dimension_numbers = #tpu.dot_dimension_numbers<[1], [0], [0], [1], [0, 0, 1, 1], [], []>} : vector<4x144xbf16>, vector<144x288xbf16>, vector<4x288xf32> -> vector<4x288xf32>
    %c2_79 = arith.constant 2 : index
    %c0_80 = arith.constant 0 : index
    %c0_81 = arith.constant 0 : index
    %68 = vector.load %arg4[%c2_79, %c0_80, %c0_81] : memref<3x4x1xf32, #tpu.memory_space<vmem>>, vector<1x4x1xf32>
    %69 = vector.shape_cast %68 : vector<1x4x1xf32> to vector<4x1xf32>
    %70 = vector.broadcast %69 : vector<4x1xf32> to vector<4x288xf32>
    %71 = arith.addf %67, %70 : vector<4x288xf32>
    %cst_82 = arith.constant 0.000000e+00 : f32
    %72 = vector.broadcast %cst_82 : f32 to vector<4x288xf32>
    %73 = arith.maximumf %71, %72 : vector<4x288xf32>
    %74 = vector.broadcast %5 : vector<1x288xf32> to vector<4x288xf32>
    %75 = arith.mulf %73, %74 : vector<4x288xf32>
    %76 = tpu.concatenate %7, %29, %52, %75 in 0 : vector<4x288xf32>, vector<4x288xf32>, vector<4x288xf32>, vector<4x288xf32> -> vector<16x288xf32>
    %77 = arith.truncf %76 : vector<16x288xf32> to vector<16x288xbf16>
    %c0_83 = arith.constant 0 : index
    %c0_84 = arith.constant 0 : index
    %78 = vector.load %arg5[%c0_83, %c0_84] : memref<4x16xbf16, #tpu.memory_space<vmem>>, vector<4x16xbf16>
    %cst_85 = arith.constant dense<0.000000e+00> : vector<4x288xf32>
    %79 = tpu.matmul %78, %77, %cst_85 {dimension_numbers = #tpu.dot_dimension_numbers<[1], [0], [0], [1], [0, 0, 1, 1], [], []>} : vector<4x16xbf16>, vector<16x288xbf16>, vector<4x288xf32> -> vector<4x288xf32>
    %c0_86 = arith.constant 0 : index
    %c0_87 = arith.constant 0 : index
    %80 = vector.load %arg6[%c0_86, %c0_87] : memref<4x1xf32, #tpu.memory_space<vmem>>, vector<4x1xf32>
    %81 = vector.broadcast %80 : vector<4x1xf32> to vector<4x288xf32>
    %82 = arith.addf %79, %81 : vector<4x288xf32>
    %83 = arith.addf %7, %82 : vector<4x288xf32>
    %c0_88 = arith.constant 0 : index
    %c0_89 = arith.constant 0 : index
    %c0_90 = arith.constant 0 : index
    %84 = vector.load %arg7[%c0_88, %c0_89, %c0_90] : memref<1x4x288xf32, #tpu.memory_space<vmem>>, vector<1x4x288xf32>
    %85 = vector.shape_cast %84 : vector<1x4x288xf32> to vector<4x288xf32>
    %86 = vector.shape_cast %83 : vector<4x288xf32> to vector<1x4x288xf32>
    tpu.vector_store %arg7[%c0_88, %c0_89, %c0_90], %86 {strides = array<i32>} : memref<1x4x288xf32, #tpu.memory_space<vmem>>, vector<1x4x288xf32>,
    return
  }
  func.func @transform_0(%arg0: i32) -> (i32, i32, i32) {
    %c0_i32 = arith.constant 0 : i32
    %c0_i32_0 = arith.constant 0 : i32
    %c0_i32_1 = arith.constant 0 : i32
    return %arg0, %c0_i32, %c0_i32_0 : i32, i32, i32
  }
  func.func @transform_1(%arg0: i32) -> (i32, i32) {
    %c0_i32 = arith.constant 0 : i32
    %c0_i32_0 = arith.constant 0 : i32
    %c0_i32_1 = arith.constant 0 : i32
    return %c0_i32, %c0_i32_0 : i32, i32
  }
  func.func @transform_2(%arg0: i32) -> (i32, i32, i32) {
    %c0_i32 = arith.constant 0 : i32
    %c0_i32_0 = arith.constant 0 : i32
    %c0_i32_1 = arith.constant 0 : i32
    %c0_i32_2 = arith.constant 0 : i32
    return %c0_i32, %c0_i32_0, %c0_i32_1 : i32, i32, i32
  }
  func.func @transform_3(%arg0: i32) -> (i32, i32, i32) {
    %c0_i32 = arith.constant 0 : i32
    %c0_i32_0 = arith.constant 0 : i32
    %c0_i32_1 = arith.constant 0 : i32
    %c0_i32_2 = arith.constant 0 : i32
    return %c0_i32, %c0_i32_0, %c0_i32_1 : i32, i32, i32
  }
  func.func @transform_4(%arg0: i32) -> (i32, i32) {
    %c0_i32 = arith.constant 0 : i32
    %c0_i32_0 = arith.constant 0 : i32
    %c0_i32_1 = arith.constant 0 : i32
    return %c0_i32, %c0_i32_0 : i32, i32
  }
  func.func @transform_5(%arg0: i32) -> (i32, i32) {
    %c0_i32 = arith.constant 0 : i32
    %c0_i32_0 = arith.constant 0 : i32
    %c0_i32_1 = arith.constant 0 : i32
    return %c0_i32, %c0_i32_0 : i32, i32
  }
  func.func @transform_6(%arg0: i32) -> (i32, i32, i32) {
    %c0_i32 = arith.constant 0 : i32
    %c0_i32_0 = arith.constant 0 : i32
    %c0_i32_1 = arith.constant 0 : i32
    return %arg0, %c0_i32, %c0_i32_0 : i32, i32, i32
  }
}

</mosaic_0001>

<bundles_post_ra>
// kernel: tpu_custom_call.1
= control target key start
LH: loop header
LB: loop body
LE: loop exit
PB: predicated region body
PF: predicated region fallthrough
CT: control target
= control target key end

     0   :  { %11 = vsyncpa [#allocation4], 0  ;;  %s2780_s0 = inlined_call_operand.hbm [shape: f32[2,4,326], index: 0, kind: input, shape index: {}]   ;;  %s2781_s1 = inlined_call_operand.vmem [shape: f32[1,288], index: 1, kind: input, shape index: {}]   ;;  %s2782_s2 = inlined_call_operand.vmem [shape: bf16[3,4,144], index: 2, kind: input, shape index: {}]   ;;  %s2783_s3 = inlined_call_operand.vmem [shape: f32[3,4,1], index: 3, kind: input, shape index: {}]   ;;  %s2784_s4 = inlined_call_operand.vmem [shape: bf16[4,16], index: 4, kind: input, shape index: {}]   ;;  %s2785_s5 = inlined_call_operand.vmem [shape: f32[4,1], index: 5, kind: input, shape index: {}]   ;;  %s2786_s6 = inlined_call_operand.hbm [shape: f32[2,4,288], index: 6, kind: output, shape index: {}]  }
   0x1   :  { %13 = vsyncpa [#allocation4 + $0x1], 0 }
   0x2   :  { %14 = vsyncpa [#allocation5], 0 }
   0x3   :  { %16 = vsyncpa [#allocation5 + $0x1], 0  ;;  %s2180_s21 = smov 0   ;;  %s2182_s22 = smov 0  }
   0x4   :  { %s2184_s23 = smov 0   ;;  %s2186_s24 = smov 0  }
   0x5 LB: > { %s2201_s25 = sadd.s32 4294967295, %s2129_s24   ;;  %s1576_s26 = sadd.s32 4294967294, %s2129_s24   ;;  %s2129_s24 = sphi %s2186_s24, %s2804_s24   ;;  %s2125_s23 = sphi %s2184_s23, %s2803_s23   ;;  %s2121_s22 = sphi %s2182_s22, %s2802_s22   ;;  %s2117_s21 = sphi %s2180_s21, %s2801_s21  }
   0x6   : > { %s2205_s27 = sadd.s32 1, %s2129_s24   ;;  %s29_s28 = sadd.s32 1, %s2125_s23 }
   0x7   : > { %s26_s29 = ssub.s32 %s2129_s24, %s2205_s27  ;;  %p36_p0 = scmp.ne.s32.totalorder %s2125_s23, %s2121_s22 }
   0x8   : > { %p27_p1 = scmp.eq.s32.totalorder %s26_s29, 0  ;;  %p37_p2 = scmp.eq.s32.totalorder %s2129_s24, 0 }
   0x9   : > { %p42_p3 = scmp.ne.s32.totalorder %s2121_s22, %s2117_s21  ;;  %p43_p4 = scmp.eq.s32.totalorder %s2201_s25, 0 }
   0xa   : > { %s2217_s30 = scalar_select %p27_p1, %s2125_s23, %s29_s28  }
   0xb   : > { %p38_p5 = por %p37_p2, %p36_p0  ;;  %p2219_p6 = por %p43_p4, %p42_p3 }
   0xc   : > { %p171_p7 = scmp.eq.s32.totalorder %s2201_s25, 1  ;;  %p177_p8 = scmp.eq.s32.totalorder %s1576_s26, 1 }
   0xd   : > { %s2790_s7 = scalar_select %p2219_p6, 1, 0 }
   0xe   : > { %p1623_p10 = scmp.lt.s32.totalorder %s2129_s24, 2  ;;  %p2226_p11 = por %p171_p7, %p36_p0 }
   0xf   : > { %p2230_p12 = por %p177_p8, %p42_p3  ;;  %s212_s10 = sand.u32 1, %s2125_s23  }
  0x10   : > { %s2791_s8 = scalar_select %p2226_p11, 1, 0 }
  0x11   : > { %s2792_s9 = scalar_select %p2230_p12, 1, 0 }
  0x12   : > { %s1608_s11 = smul.u32 192, %s2129_s24  ;;  %p2241_p13 = pnand %p1623_p10, %p38_p5 }
  0x13   : > { %s1607_s12 = smul.u32 12, %s212_s10  ;;  %s213_s19 = scalar_lea.sflag [#allocation4], %s212_s10 }
  0x14   : > { %s2239_s15 = scalar_lea.hbm %s2780_s0, %s1608_s11  ;;  %p2039_p3 = pneg %p2241_p13 }
  0x15   : > { %s216_s17 = scalar_lea.vmem [#allocation3], %s1607_s12  ;;  %s2037_s20 = scalar_lea.hbm %s2239_s15, 192 }
  0x16   : > { %s224_s18 = sshll.u32 %s216_s17, 4  ;;  %p2038_p2 = scmp.ne.s32.totalorder %s2239_s15, %s2037_s20  ;;  %s225_s18 = int_to_ptr.vmem [resolvable:$true] %s224_s18 }
  0x17   : > { %s2042_s29 = scalar_lea.hbm %s2780_s0, 384  ;;  %p2043_p5 = scmp.lt.s32.totalorder %s2239_s15, %s2780_s0 }
  0x18   : > { %p2040_p4 = pnand %p2039_p3, %p2038_p2  ;;  %p2044_p8 = scmp.lt.s32.totalorder %s2042_s29, %s2037_s20 }
  0x1a   : > { %p2041_p7 = pneg %p2040_p4  ;;  %p2045_p10 = por %p2044_p8, %p2043_p5 }
  0x1c   : > { %p2046_p9 = pnand %p2045_p10, %p2041_p7 }
  0x1e   : > { %2049 = shalt.err (!%p2046_p9)
}
  0x1f   : > { %s2050_s12 = scalar_lea.vmem %s225_s18, 192  ;;  %s2131_s10 = smov [#allocation3]  }
  0x20   : > { %p2051_p0 = scmp.ne.s32.totalorder %s225_s18, %s2050_s12  ;;  %s2055_s14 = sshll.u32 %s2131_s10, 4  ;;  %s2056_s14 = int_to_ptr.vmem [resolvable:$false] %s2055_s14 }
  0x21   : > { %s2057_s17 = scalar_lea.vmem %s2056_s14, 384  ;;  %p2058_p2 = scmp.lt.s32.totalorder %s225_s18, %s2056_s14 }
  0x22   : > { %p2053_p1 = pnand %p2051_p0, %p2039_p3  ;;  %p2059_p4 = scmp.lt.s32.totalorder %s2057_s17, %s2050_s12 }
  0x24   : > { %p2054_p12 = pneg %p2053_p1  ;;  %p2060_p11 = por %p2059_p4, %p2058_p2 }
  0x26   : > { %p2061_p6 = pnand %p2060_p11, %p2054_p12 }
  0x28   : > { %2064 = shalt.err (!%p2061_p6)
}
  0x29   : > { %1618 = dma.hbm_to_vmem [thread:$0]  (!%p2241_p13), %s2239_s15, 192, %s225_s18, %s213_s19  }
  0x2a   : > { %p2794_p9 = scmp.lt.s32.totalorder %s2129_s24, 3  ;;  %p2795_p7 = scmp.ge.s32.totalorder %s2129_s24, 1 }
  0x2c   : > { %p230_p5 = pnand %p2795_p7, %p2794_p9 }
  0x2d   : > { %s2266_s20 = sand.u32 (!%p230_p5), 1, %s2121_s22   ;;  %p2796_p6 = scmp.ne.s32.totalorder (!%p230_p5), %s2790_s7, 0 }
  0x2e   : > { %233 = sbr.rel (%p230_p5) target bundleno = 2114 (0x842), region = 44  ;;  %s236_s28 = scalar_lea.sflag (!%p230_p5), [#allocation4], %s2266_s20 }
  0x2f   : > { %s2789_s26 = smul.u32 (!%p230_p5), 12, %s2266_s20 }
  0x31   : > { %s2272_s29 = scalar_lea.vmem (!%p230_p5), [#allocation3], %s2789_s26 }
  0x33   : > { %2108 = dma.done.wait (%p2796_p6), %s236_s28, 192  }
  0x34   : > { %2110 = vsyncadd (%p2796_p6), %s236_s28, 4294967104  ;;  %vm271_vm0 = vcmask 572416   ;;  %v2132_v0 = vmov 0.0   ;;  %vm283_vm1 = vcmask 568320   ;;  %v2285_v1 = vld [vmem:[%s2272_s29] sm:$0xff]  ;;  %s2133_s7 = smov 91  }
  0x35   : > { %274 = vst [vmem:[#allocation2 + $0x20] sm:$0xff] %v2132_v0  ;;  %275 = vst.msk [vmem:[#allocation2 + $0x28] sm:$0xff] %vm271_vm0, %v2132_v0  ;;  %v277_v2 = vld [vmem:[%s2272_s29 + $0x8] sm:$0xf]  ;;  %v2292_v4 = vcombine.high %v2285_v1, %v2285_v1  ;;  %s2134_s15 = smov 108   ;;  %v2135_v6 = vmov 0  }
  0x36   : > { %269 = vst [vmem:[#allocation2] sm:$0xff] %v2132_v0  ;;  %270 = vst [vmem:[#allocation2 + $0x8] sm:$0xff] %v2132_v0  ;;  %573 = vmatprep.subr.bf16.mxu1 %v2135_v6  ;;  %1789 = vset.pattern.permute.xlu0 %v2135_v6  ;;  %s2136_s16 = smov 92   ;;  %s2137_s18 = smov 109   ;;  %vm528_vm2 = vcmask 130048   ;;  %vm450_vm3 = vcmask 744448  }
  0x37   : > { %272 = vst.msk [vmem:[#allocation2 + $0x10] sm:$0xff] %vm271_vm0, %v2132_v0  ;;  %273 = vst [vmem:[#allocation2 + $0x18] sm:$0xff] %v2132_v0  ;;  %1910 = vset.pattern.permute.xlu1 %v2135_v6  ;;  %s2138_s19 = smov 110   ;;  %s2139_s11 = smov 126   ;;  %v512_v14 = vld [vmem:[%s2783_s3] sm:$0xf] }
  0x38   : > { %281 = vst [vmem:[#allocation2] sm:$0xf] %v2285_v1  ;;  %284 = vst.msk [vmem:[#allocation2 + $0x10] sm:$0xf] %vm283_vm1, %v277_v2  ;;  %s2140_s13 = smov 127   ;;  %s2141_s14 = smov 90  }
  0x39   : > { %282 = vst [vmem:[#allocation2 + $0x8] sm:$0xf] %v2292_v4  ;;  %v2344_v12 = vld.sshfl [vmem:[%s2782_s2] sm:$0x33 pattern:$0x76325410] }
  0x3a   : > { %v526_v13 = vcombine.high %v2344_v12, %v2344_v12  ;;  %vm427_vm4 = vcmask 752640   ;;  %vm404_vm5 = vcmask 883712   ;;  %vm381_vm6 = vcmask 891904   ;;  %s2142_s17 = smov 19   ;;  %p2798_p12 = scmp.ne.s32.totalorder %s2791_s8, 0 }
  0x3b   : > { %vm358_vm7 = vcmask 900096   ;;  %vm335_vm8 = vcmask 1031168   ;;  %vm312_vm9 = vcmask 1039360   ;;  %vm473_vm10 = vcmask 736256  }
  0x3c   : > { %v2288_v3 = vld [vmem:[#allocation2 + $0x28] sm:$0xff]  ;;  %1582 = vmatprep.mubr.msk.bf16.mxu0 %vm528_vm2, %v526_v13  ;;  %1583 = vmatprep.mubr.msk.bf16.mxu1 %vm528_vm2, %v526_v13  ;;  %vm653_vm11 = vcmask 1047708   ;;  %vm647_vm12 = vcmask 154624   ;;  %vm656_vm13 = vcmask 416772   ;;  %vm996_vm14 = vcmask 1043608  }
  0x3d   : > { %v2297_v5 = vpack.i.bf16 %v2288_v3, %v2132_v0  ;;  %vm999_vm15 = vcmask 412672   ;;  %vm2143_vm0 = vmmov 0   ;;  %vm1345_vm1 = vcmask 1043456  }
  0x3f   : > { %1670 = vrot.lane.b32.xlu0 %v2297_v5, %s2133_s7  ;;  %1680 = vrot.lane.b32.xlu1 %v2297_v5, %s2134_s15  ;;  %v2309_v7 = vld [vmem:[#allocation2] sm:$0xff]  ;;  %v2313_v9 = vld [vmem:[#allocation2 + $0x10] sm:$0xff] }
  0x40   : > { %v1684_v8 = vpack.i.bf16 %v2132_v0, %v2309_v7  ;;  %v2315_v10 = vld [vmem:[#allocation2 + $0x8] sm:$0xff] }
  0x41   : > { %v1699_v11 = vpack.i.bf16 %v2313_v9, %v2315_v10 }
  0x43   : > { %1675 = vrot.lane.b32.xlu0 %v2297_v5, %s2136_s16  ;;  %1685 = vrot.lane.b32.xlu1 %v1684_v8, %s2133_s7 }
  0x47   : > { %1695 = vrot.lane.b32.xlu0 %v1684_v8, %s2134_s15  ;;  %1690 = vrot.lane.b32.xlu1 %v1684_v8, %s2136_s16 }
  0x4b   : > { %1700 = vrot.lane.b32.xlu0 %v1699_v11, %s2133_s7  ;;  %1705 = vrot.lane.b32.xlu1 %v1699_v11, %s2136_s16 }
  0x4f   : > { %1710 = vrot.lane.b32.xlu0 %v1699_v11, %s2134_s15  ;;  %1720 = vrot.lane.b32.xlu1 %v1699_v11, %s2137_s18 }
  0x53   : > { %1715 = vrot.lane.b32.xlu0 %v2297_v5, %s2137_s18  ;;  %1725 = vrot.lane.b32.xlu1 %v1684_v8, %s2137_s18 }
  0x57   : > { %1730 = vrot.lane.b32.xlu0 %v1699_v11, %s2138_s19  ;;  %1735 = vrot.lane.b32.xlu1 %v2297_v5, %s2138_s19 }
  0x5b   : > { %1740 = vrot.lane.b32.xlu0 %v1684_v8, %s2138_s19  ;;  %1745 = vrot.lane.b32.xlu1 %v1699_v11, %s2139_s11 }
  0x5f   : > { %1750 = vrot.lane.b32.xlu0 %v2297_v5, %s2139_s11  ;;  %1755 = vrot.lane.b32.xlu1 %v1684_v8, %s2139_s11 }
  0x63   : > { %1760 = vrot.lane.b32.xlu0 %v1699_v11, %s2140_s13  ;;  %1765 = vrot.lane.b32.xlu1 %v2297_v5, %s2140_s13 }
  0x67   : > { %1770 = vrot.lane.b32.xlu0 %v1684_v8, %s2140_s13  ;;  %1775 = vrot.lane.b32.xlu1 %v1699_v11, %s2141_s14 }
  0x6b   : > { %1780 = vrot.lane.b32.xlu0 %v2297_v5, %s2141_s14  ;;  %1785 = vrot.lane.b32.xlu1 %v1684_v8, %s2141_s14 }
  0x6f   : > { %515 = vperm.xlu0 %1789, %v512_v14  }
  0xb1   : > { %v1671_v15 = vpop.permute.xlu0 %1670  ;;  %v2357_v16 = vpop.permute.xlu1 %1680 }
  0xb2   : > { %v1673_v20 = vunpack.i.h.bf16 %v1671_v15  ;;  %v1672_v21 = vunpack.i.l.bf16 %v1671_v15  ;;  %v1683_v30 = vunpack.i.h.bf16 %v2357_v16  ;;  %v1682_v44 = vunpack.i.l.bf16 %v2357_v16 }
  0xb4   : > { %v454_v32 = vsel %vm450_vm3, %v1672_v21, %v1673_v20  ;;  %v408_v63 = vsel %vm404_vm5, %v1682_v44, %v1683_v30 }
  0xb5   : > { %v1676_v17 = vpop.permute.xlu0 %1675  ;;  %v1686_v18 = vpop.permute.xlu1 %1685 }
  0xb6   : > { %v1688_v22 = vunpack.i.h.bf16 %v1686_v18  ;;  %v1678_v24 = vunpack.i.h.bf16 %v1676_v17  ;;  %v1677_v26 = vunpack.i.l.bf16 %v1676_v17  ;;  %v1687_v27 = vunpack.i.l.bf16 %v1686_v18 }
  0xb8   : > { %v453_v33 = vsel %vm450_vm3, %v1688_v22, %v1672_v21  ;;  %v431_v47 = vsel %vm427_vm4, %v1677_v26, %v1678_v24 }
  0xb9   : > { %v2359_v19 = vpop.permute.xlu0 %1695  ;;  %v1691_v23 = vpop.permute.xlu1 %1690 }
  0xba   : > { %v1693_v31 = vunpack.i.h.bf16 %v1691_v23  ;;  %v1692_v34 = vunpack.i.l.bf16 %v1691_v23  ;;  %v1698_v51 = vunpack.i.h.bf16 %v2359_v19  ;;  %v1697_v55 = vunpack.i.l.bf16 %v2359_v19 }
  0xbc   : > { %v430_v59 = vsel %vm427_vm4, %v1693_v31, %v1677_v26  ;;  %v407_v19 = vsel %vm404_vm5, %v1698_v51, %v1682_v44 }
  0xbd   : > { %v1701_v25 = vpop.permute.xlu0 %1700  ;;  %v1706_v35 = vpop.permute.xlu1 %1705 }
  0xbe   : > { %v1703_v28 = vunpack.i.h.bf16 %v1701_v25  ;;  %v1702_v29 = vunpack.i.l.bf16 %v1701_v25  ;;  %v1708_v39 = vunpack.i.h.bf16 %v1706_v35  ;;  %v1707_v40 = vunpack.i.l.bf16 %v1706_v35 }
  0xc0   : > { %v507_v36 = vpack.c.bf16 %v1673_v20, %v1703_v28  ;;  %v452_v37 = vsel %vm450_vm3, %v1702_v29, %v1703_v28  ;;  %v451_v38 = vsel %vm450_vm3, %v1687_v27, %v1702_v29  ;;  %v504_v48 = vpack.c.bf16 %v1678_v24, %v1708_v39 }
  0xc1   : > { %v1711_v41 = vpop.permute.xlu0 %1710  ;;  %v506_v42 = vpack.c.bf16 %v454_v32, %v452_v37  ;;  %v505_v43 = vpack.c.bf16 %v453_v33, %v451_v38  ;;  %v429_v49 = vsel %vm427_vm4, %v1707_v40, %v1708_v39  ;;  %v428_v50 = vsel %vm427_vm4, %v1692_v34, %v1707_v40  ;;  %v1721_v52 = vpop.permute.xlu1 %1720 }
  0xc2   : > { %v1713_v45 = vunpack.i.h.bf16 %v1711_v41  ;;  %v1712_v46 = vunpack.i.l.bf16 %v1711_v41  ;;  %574 = vmatpush1.bf16.msra.mxu1 %v507_v36  ;;  %v503_v53 = vpack.c.bf16 %v431_v47, %v429_v49  ;;  %v1723_v56 = vunpack.i.h.bf16 %v1721_v52 }
  0xc3   : > { %532 = vmatprep.subr.bf16.mxu0 %v506_v42  ;;  %575 = vmatprep.subr.bf16.mxu1 %v2135_v6  ;;  %v1722_v57 = vunpack.i.l.bf16 %v1721_v52  ;;  %v502_v62 = vpack.c.bf16 %v430_v59, %v428_v50 }
  0xc4   : > { %533 = vmatpush1.bf16.msra.mxu0 %v505_v43  ;;  %v406_v54 = vsel %vm404_vm5, %v1712_v46, %v1713_v45  ;;  %v405_v8 = vsel %vm404_vm5, %v1697_v55, %v1712_v46  ;;  %v501_v13 = vpack.c.bf16 %v1683_v30, %v1713_v45 }
  0xc5   : > { %v1716_v58 = vpop.permute.xlu0 %1715  ;;  %534 = vmatprep.subr.bf16.mxu0 %v503_v53  ;;  %v500_v2 = vpack.c.bf16 %v408_v63, %v406_v54  ;;  %v383_v11 = vsel %vm381_vm6, %v1722_v57, %v1723_v56  ;;  %v1726_v14 = vpop.permute.xlu1 %1725  ;;  %v499_v20 = vpack.c.bf16 %v407_v19, %v405_v8  ;;  %v485_v19 = vpack.c.bf16 %v2132_v0, %v2315_v10 }
  0xc6   : > { %v1718_v60 = vunpack.i.h.bf16 %v1716_v58  ;;  %v1717_v61 = vunpack.i.l.bf16 %v1716_v58  ;;  %576 = vmatpush1.bf16.msra.mxu1 %v504_v48  ;;  %v1728_v16 = vunpack.i.h.bf16 %v1726_v14  ;;  %v1727_v17 = vunpack.i.l.bf16 %v1726_v14 }
  0xc7   : > { %577 = vmatprep.subr.bf16.mxu1 %v2135_v6 }
  0xc8   : > { %535 = vmatpush1.bf16.msra.mxu0 %v502_v62  ;;  %v385_v15 = vsel %vm381_vm6, %v1717_v61, %v1718_v60  ;;  %v382_v24 = vsel %vm381_vm6, %v1727_v17, %v1722_v57  ;;  %v384_v25 = vsel %vm381_vm6, %v1728_v16, %v1717_v61  ;;  %v498_v26 = vpack.c.bf16 %v1718_v60, %v1723_v56 }
  0xc9   : > { %v1731_v18 = vpop.permute.xlu0 %1730  ;;  %536 = vmatprep.subr.bf16.mxu0 %v500_v2  ;;  %v497_v21 = vpack.c.bf16 %v385_v15, %v383_v11  ;;  %v1736_v27 = vpop.permute.xlu1 %1735  ;;  %v496_v33 = vpack.c.bf16 %v384_v25, %v382_v24  ;;  %v486_v24 = vpack.c.bf16 %v2288_v3, %v2313_v9 }
  0xca   : > { %578 = vmatpush1.bf16.msra.mxu1 %v501_v13  ;;  %v1733_v22 = vunpack.i.h.bf16 %v1731_v18  ;;  %v1732_v23 = vunpack.i.l.bf16 %v1731_v18  ;;  %v1738_v28 = vunpack.i.h.bf16 %v1736_v27  ;;  %v1737_v29 = vunpack.i.l.bf16 %v1736_v27 }
  0xcb   : > { %579 = vmatprep.subr.bf16.mxu1 %v2135_v6  ;;  %v484_v27 = vpack.c.bf16 %v2132_v0, %v2309_v7 }
  0xcc   : > { %537 = vmatpush1.bf16.msra.mxu0 %v499_v20  ;;  %v495_v34 = vpack.c.bf16 %v1738_v28, %v1733_v22  ;;  %v360_v35 = vsel %vm358_vm7, %v1732_v23, %v1733_v22  ;;  %v362_v36 = vsel %vm358_vm7, %v1737_v29, %v1738_v28 }
  0xcd   : > { %v1741_v30 = vpop.permute.xlu0 %1740  ;;  %538 = vmatprep.subr.bf16.mxu0 %v497_v21  ;;  %v1746_v37 = vpop.permute.xlu1 %1745  ;;  %v494_v38 = vpack.c.bf16 %v362_v36, %v360_v35  ;;  %v617_v35 = vlaneseq }
  0xce   : > { %v1743_v31 = vunpack.i.h.bf16 %v1741_v30  ;;  %v1742_v32 = vunpack.i.l.bf16 %v1741_v30  ;;  %580 = vmatpush1.bf16.msra.mxu1 %v498_v26  ;;  %v1748_v41 = vunpack.i.h.bf16 %v1746_v37  ;;  %v1747_v42 = vunpack.i.l.bf16 %v1746_v37 }
  0xcf   : > { %581 = vmatprep.subr.bf16.mxu1 %v2135_v6  ;;  %v618_v36 = vshrl.u32 %v617_v35, 7 }
  0xd0   : > { %539 = vmatpush1.bf16.msra.mxu0 %v496_v33  ;;  %v359_v39 = vsel %vm358_vm7, %v1742_v32, %v1732_v23  ;;  %v361_v40 = vsel %vm358_vm7, %v1743_v31, %v1737_v29  ;;  %v337_v47 = vsel %vm335_vm8, %v1747_v42, %v1748_v41 }
  0xd1   : > { %v1751_v43 = vpop.permute.xlu0 %1750  ;;  %v493_v44 = vpack.c.bf16 %v361_v40, %v359_v39  ;;  %540 = vmatprep.subr.bf16.mxu0 %v494_v38  ;;  %v1756_v49 = vpop.permute.xlu1 %1755  ;;  %v627_v37 = vsub.s32 2, %v618_v36  ;;  %v285_v39 = vld [vmem:[%s2781_s1] sm:$0x7]  ;;  %v619_v40 = vsub.s32 0, %v618_v36 }
  0xd2   : > { %v1753_v45 = vunpack.i.h.bf16 %v1751_v43  ;;  %v1752_v46 = vunpack.i.l.bf16 %v1751_v43  ;;  %582 = vmatpush1.bf16.msra.mxu1 %v495_v34  ;;  %v1758_v51 = vunpack.i.h.bf16 %v1756_v49  ;;  %v1757_v52 = vunpack.i.l.bf16 %v1756_v49 }
  0xd3   : > { %583 = vmatprep.subr.bf16.mxu1 %v2135_v6  ;;  %v2417_v43 = vrot.slane %v285_v39, %v627_v37 }
  0xd4   : > { %v492_v48 = vpack.c.bf16 %v1753_v45, %v1748_v41  ;;  %541 = vmatpush1.bf16.msra.mxu0 %v493_v44  ;;  %v339_v50 = vsel %vm335_vm8, %v1752_v46, %v1753_v45  ;;  %v336_v57 = vsel %vm335_vm8, %v1757_v52, %v1747_v42  ;;  %v338_v58 = vsel %vm335_vm8, %v1758_v51, %v1752_v46 }
  0xd5   : > { %v1761_v53 = vpop.permute.xlu0 %1760  ;;  %v491_v54 = vpack.c.bf16 %v339_v50, %v337_v47  ;;  %v1766_v59 = vpop.permute.xlu1 %1765  ;;  %v490_v60 = vpack.c.bf16 %v338_v58, %v336_v57  ;;  %v623_v44 = vsub.s32 1, %v618_v36 }
  0xd6   : > { %584 = vmatpush1.bf16.msra.mxu1 %v492_v48  ;;  %v1763_v55 = vunpack.i.h.bf16 %v1761_v53  ;;  %v1762_v56 = vunpack.i.l.bf16 %v1761_v53  ;;  %v1768_v61 = vunpack.i.h.bf16 %v1766_v59  ;;  %v1767_v62 = vunpack.i.l.bf16 %v1766_v59 }
  0xd7   : > { %542 = vmatprep.subr.bf16.mxu0 %v491_v54  ;;  %585 = vmatprep.subr.bf16.mxu1 %v2135_v6  ;;  %v2419_v48 = vrot.slane %v285_v39, %v619_v40  ;;  %v2422_v54 = vrot.slane %v285_v39, %v623_v44 }
  0xd8   : > { %543 = vmatpush1.bf16.msra.mxu0 %v490_v60  ;;  %v489_v11 = vpack.c.bf16 %v1768_v61, %v1763_v55  ;;  %v314_v13 = vsel %vm312_vm9, %v1762_v56, %v1763_v55  ;;  %v316_v14 = vsel %vm312_vm9, %v1767_v62, %v1768_v61 }
  0xd9   : > { %v1771_v63 = vpop.permute.xlu0 %1770  ;;  %v1776_v15 = vpop.permute.xlu1 %1775  ;;  %v488_v16 = vpack.c.bf16 %v316_v14, %v314_v13 }
  0xda   : > { %v1773_v2 = vunpack.i.h.bf16 %v1771_v63  ;;  %v1772_v8 = vunpack.i.l.bf16 %v1771_v63  ;;  %v1778_v20 = vunpack.i.h.bf16 %v1776_v15  ;;  %v1777_v21 = vunpack.i.l.bf16 %v1776_v15  ;;  %586 = vmatpush1.bf16.msra.mxu1 %v489_v11 }
  0xdb   : > { %544 = vmatprep.subr.bf16.mxu0 %v488_v16  ;;  %587 = vmatprep.subr.bf16.mxu1 %v2135_v6 }
  0xdc   : > { %v313_v17 = vsel %vm312_vm9, %v1772_v8, %v1762_v56  ;;  %v315_v18 = vsel %vm312_vm9, %v1773_v2, %v1767_v62  ;;  %v475_v28 = vsel %vm473_vm10, %v1777_v21, %v1778_v20 }
  0xdd   : > { %v1781_v22 = vpop.permute.xlu0 %1780  ;;  %v487_v23 = vpack.c.bf16 %v315_v18, %v313_v17  ;;  %v1786_v10 = vpop.permute.xlu1 %1785 }
  0xde   : > { %v1783_v25 = vunpack.i.h.bf16 %v1781_v22  ;;  %v1782_v26 = vunpack.i.l.bf16 %v1781_v22  ;;  %v1788_v30 = vunpack.i.h.bf16 %v1786_v10  ;;  %v1787_v31 = vunpack.i.l.bf16 %v1786_v10  ;;  %588 = vmatpush1.bf16.msra.mxu1 %v486_v24  ;;  %v1585_v22 = vld [vmem:[%s2783_s3 + $0x4] sm:$0xf] }
  0xdf   : > { %545 = vmatpush1.bf16.msra.mxu0 %v487_v23  ;;  %603 = vmatprep.subr.bf16.mxu1 %v2135_v6 }
  0xe0   : > { %546 = vmatprep.subr.bf16.mxu0 %v485_v19  ;;  %v477_v29 = vsel %vm473_vm10, %v1782_v26, %v1783_v25  ;;  %v510_v9 = vpack.c.bf16 %v1783_v25, %v1778_v20  ;;  %v474_v33 = vsel %vm473_vm10, %v1787_v31, %v1777_v21  ;;  %v476_v34 = vsel %vm473_vm10, %v1788_v30, %v1782_v26  ;;  %v2494_v20 = vld.sshfl [vmem:[%s2782_s2 + $0x4] sm:$0x33 pattern:$0x76325410] }
  0xe1   : > { %v509_v32 = vpack.c.bf16 %v477_v29, %v475_v28  ;;  %v508_v7 = vpack.c.bf16 %v476_v34, %v474_v33  ;;  %v890_v21 = vcombine.high %v2494_v20, %v2494_v20 }
  0xe2   : > { %604 = vmatpush2.bf16.msra.mxu1 %v510_v9 }
  0xe3   : > { %547 = vmatpush1.bf16.msra.mxu0 %v484_v27  ;;  %936 = vmatprep.subr.bf16.mxu1 %v2135_v6 }
  0xe4   : > { %562 = vmatprep.subr.bf16.mxu0 %v509_v32 }
  0xe5   : > { %606 = vmatmul.mubr.bf16.vlgmr.msra.gmra.mxu1 %v2344_v12 }
  0xe6   : > { %1588 = vmatprep.mubr.msk.bf16.mxu1 %vm528_vm2, %v890_v21 }
  0xe7   : > { %563 = vmatpush2.bf16.msra.mxu0 %v508_v7 }
  0xea   : > { %565 = vmatmul.mubr.bf16.vlgmr.msra.gmra.mxu0 %v2344_v12  ;;  %v516_v38 = vpop.permute.xlu0 %515 }
  0xeb   : > { %1587 = vmatprep.mubr.msk.bf16.mxu0 %vm528_vm2, %v890_v21 }
 0x1a5   : > { %v607_v41 = vpop.f32.mrf.mxu1 }
 0x1a6   : > { %v608_v42 = vadd.f32 %v607_v41, %v516_v38 }
 0x1a7   : > { %v609_v46 = vpop.f32.mrf.mxu1 }
 0x1a8   : > { %v615_v12 = vmax.f32 %v608_v42, 0.0 }
 0x1a9   : > { %v610_v50 = vpop.f32.mrf.mxu1 }
 0x1aa   : > { %v566_v45 = vpop.f32.mrf.mxu0  ;;  %v634_v52 = vmul.f32 %v2417_v43, %v615_v12 }
 0x1ab   : > { %v567_v47 = vadd.f32 %v566_v45, %v516_v38  ;;  %v611_v56 = vpop.f32.mrf.mxu1 }
 0x1ac   : > { %v568_v49 = vpop.f32.mrf.mxu0  ;;  %v640_v58 = vrot.slane %v634_v52, 4 }
 0x1ad   : > { %v613_v51 = vmax.f32 %v567_v47, 0.0  ;;  %v569_v53 = vadd.f32 %v568_v49, %v516_v38 }
 0x1ae   : > { %v570_v55 = vpop.f32.mrf.mxu0  ;;  %645 = vrot.lane.b32.xlu0 %v640_v58, %s2142_s17 }
 0x1af   : > { %v632_v57 = vmul.f32 %v2419_v48, %v613_v51  ;;  %v614_v59 = vmax.f32 %v569_v53, 0.0 }
 0x1b0   : > { %v571_v60 = vpop.f32.mrf.mxu0 }
 0x1b1   : > { %v638_v61 = vrot.slane %v632_v57, 4  ;;  %v633_v62 = vmul.f32 %v2422_v54, %v614_v59 }
 0x1b2   : > { %1791 = vrot.lane.b32.xlu0 %v2297_v5, %s2133_s7 }
 0x1b3   : > { %641 = vrot.lane.b32.xlu1 %v638_v61, %s2142_s17  ;;  %v639_v63 = vrot.slane %v633_v62, 4 }
 0x1b6   : > { %1801 = vrot.lane.b32.xlu0 %v2297_v5, %s2134_s15 }
 0x1b7   : > { %643 = vrot.lane.b32.xlu1 %v639_v63, %s2142_s17 }
 0x1bb   : > { %1796 = vrot.lane.b32.xlu1 %v2297_v5, %s2136_s16 }
 0x220   : > { %v646_v8 = vpop.permute.xlu0 %645 }
 0x224   : > { %v1792_v23 = vpop.permute.xlu0 %1791 }
 0x225   : > { %v2435_v2 = vpop.permute.xlu1 %641  ;;  %v1794_v29 = vunpack.i.h.bf16 %v1792_v23  ;;  %v1793_v30 = vunpack.i.l.bf16 %v1792_v23 }
 0x226   : > { %654 = vst.msk [vmem:[#allocation2] sm:$0xf0] %vm653_vm11, %v2435_v2 }
 0x227   : > { %v817_v12 = vsel %vm450_vm3, %v1793_v30, %v1794_v29 }
 0x228   : > { %v2505_v24 = vpop.permute.xlu0 %1801 }
 0x229   : > { %v644_v11 = vpop.permute.xlu1 %643  ;;  %v1804_v50 = vunpack.i.h.bf16 %v2505_v24  ;;  %v1803_v52 = vunpack.i.l.bf16 %v2505_v24 }
 0x22a   : > { %v2440_v13 = vsel %vm647_vm12, %v2435_v2, %v644_v11  ;;  %v2443_v14 = vsel %vm647_vm12, %v644_v11, %v646_v8 }
 0x22b   : > { %655 = vst [vmem:[#allocation2 + $0x8] sm:$0xf0] %v2440_v13  ;;  %657 = vst.msk [vmem:[#allocation2 + $0x10] sm:$0xf0] %vm656_vm13, %v2443_v14 }
 0x22d   : > { %v2447_v15 = vld [vmem:[#allocation2] sm:$0xff]  ;;  %v1797_v25 = vpop.permute.xlu1 %1796 }
 0x22e   : > { %v1810_v16 = vpack.i.bf16 %v2132_v0, %v2447_v15  ;;  %v1799_v36 = vunpack.i.h.bf16 %v1797_v25  ;;  %v1798_v37 = vunpack.i.l.bf16 %v1797_v25 }
 0x230   : > { %1811 = vrot.lane.b32.xlu0 %v1810_v16, %s2136_s16  ;;  %1806 = vrot.lane.b32.xlu1 %v1810_v16, %s2133_s7  ;;  %v795_v56 = vsel %vm427_vm4, %v1798_v37, %v1799_v36 }
 0x232   : > { %v2453_v17 = vld [vmem:[#allocation2 + $0x8] sm:$0xff]  ;;  %v2455_v18 = vld [vmem:[#allocation2 + $0x10] sm:$0xff] }
 0x233   : > { %v2461_v19 = vpack.i.bf16 %v2455_v18, %v2453_v17 }
 0x234   : > { %1831 = vrot.lane.b32.xlu0 %v1810_v16, %s2137_s18  ;;  %1816 = vrot.lane.b32.xlu1 %v1810_v16, %s2134_s15 }
 0x238   : > { %1836 = vrot.lane.b32.xlu0 %v2461_v19, %s2136_s16  ;;  %1821 = vrot.lane.b32.xlu1 %v2461_v19, %s2133_s7 }
 0x23c   : > { %1841 = vrot.lane.b32.xlu0 %v2297_v5, %s2138_s19  ;;  %1826 = vrot.lane.b32.xlu1 %v2297_v5, %s2137_s18 }
 0x240   : > { %1856 = vrot.lane.b32.xlu0 %v2461_v19, %s2137_s18  ;;  %1846 = vrot.lane.b32.xlu1 %v2461_v19, %s2134_s15 }
 0x244   : > { %1871 = vrot.lane.b32.xlu0 %v1810_v16, %s2139_s11  ;;  %1851 = vrot.lane.b32.xlu1 %v1810_v16, %s2138_s19 }
 0x248   : > { %1876 = vrot.lane.b32.xlu0 %v2461_v19, %s2139_s11  ;;  %1861 = vrot.lane.b32.xlu1 %v2461_v19, %s2138_s19 }
 0x24c   : > { %1881 = vrot.lane.b32.xlu0 %v2297_v5, %s2140_s13  ;;  %1866 = vrot.lane.b32.xlu1 %v2297_v5, %s2139_s11 }
 0x250   : > { %1901 = vrot.lane.b32.xlu0 %v2461_v19, %s2141_s14  ;;  %1886 = vrot.lane.b32.xlu1 %v2461_v19, %s2140_s13 }
 0x254   : > { %1906 = vrot.lane.b32.xlu0 %v1810_v16, %s2141_s14  ;;  %1891 = vrot.lane.b32.xlu1 %v1810_v16, %s2140_s13 }
 0x258   : > { %1896 = vrot.lane.b32.xlu1 %v2297_v5, %s2141_s14 }
 0x25c   : > { %879 = vperm.xlu1 %1910, %v1585_v22  }
 0x2a2   : > { %v1812_v26 = vpop.permute.xlu0 %1811  ;;  %v1807_v27 = vpop.permute.xlu1 %1806 }
 0x2a3   : > { %v1809_v31 = vunpack.i.h.bf16 %v1807_v27  ;;  %v1808_v32 = vunpack.i.l.bf16 %v1807_v27  ;;  %v1814_v40 = vunpack.i.h.bf16 %v1812_v26  ;;  %v1813_v46 = vunpack.i.l.bf16 %v1812_v26 }
 0x2a5   : > { %v816_v41 = vsel %vm450_vm3, %v1809_v31, %v1793_v30  ;;  %v794_v57 = vsel %vm427_vm4, %v1814_v40, %v1798_v37 }
 0x2a6   : > { %v2507_v28 = vpop.permute.xlu0 %1831  ;;  %v1817_v10 = vpop.permute.xlu1 %1816 }
 0x2a7   : > { %v1819_v58 = vunpack.i.h.bf16 %v1817_v10  ;;  %v1818_v59 = vunpack.i.l.bf16 %v1817_v10  ;;  %v1833_v30 = vunpack.i.l.bf16 %v2507_v28 }
 0x2a9   : > { %v772_v26 = vsel %vm404_vm5, %v1819_v58, %v1803_v52 }
 0x2aa   : > { %v1837_v9 = vpop.permute.xlu0 %1836  ;;  %v1822_v5 = vpop.permute.xlu1 %1821 }
 0x2ab   : > { %v1839_v33 = vunpack.i.h.bf16 %v1837_v9  ;;  %v1838_v34 = vunpack.i.l.bf16 %v1837_v9  ;;  %v1824_v7 = vunpack.i.h.bf16 %v1822_v5  ;;  %v1823_v35 = vunpack.i.l.bf16 %v1822_v5 }
 0x2ad   : > { %v869_v38 = vpack.c.bf16 %v1794_v29, %v1824_v7  ;;  %v814_v39 = vsel %vm450_vm3, %v1808_v32, %v1823_v35  ;;  %v815_v45 = vsel %vm450_vm3, %v1823_v35, %v1824_v7  ;;  %v793_v49 = vsel %vm427_vm4, %v1838_v34, %v1839_v33 }
 0x2ae   : > { %v2511_v42 = vpop.permute.xlu0 %1841  ;;  %v1827_v44 = vpop.permute.xlu1 %1826  ;;  %v867_v47 = vpack.c.bf16 %v816_v41, %v814_v39  ;;  %v868_v51 = vpack.c.bf16 %v817_v12, %v815_v45  ;;  %v792_v53 = vsel %vm427_vm4, %v1813_v46, %v1838_v34  ;;  %v866_v55 = vpack.c.bf16 %v1799_v36, %v1839_v33 }
 0x2af   : > { %937 = vmatpush1.bf16.msra.mxu1 %v869_v38  ;;  %v865_v62 = vpack.c.bf16 %v795_v56, %v793_v49  ;;  %v864_v21 = vpack.c.bf16 %v794_v57, %v792_v53  ;;  %v1829_v22 = vunpack.i.h.bf16 %v1827_v44  ;;  %v1828_v23 = vunpack.i.l.bf16 %v1827_v44 }
 0x2b0   : > { %938 = vmatprep.subr.bf16.mxu1 %v2135_v6  ;;  %895 = vmatprep.subr.bf16.mxu0 %v868_v51  ;;  %v773_v32 = vsel %vm404_vm5, %v1803_v52, %v1804_v50  ;;  %v1844_v5 = vunpack.i.h.bf16 %v2511_v42  ;;  %v1843_v33 = vunpack.i.l.bf16 %v2511_v42  ;;  %v1834_v35 = vunpack.i.h.bf16 %v2507_v28 }
 0x2b1   : > { %896 = vmatpush1.bf16.msra.mxu0 %v867_v47  ;;  %v751_v38 = vsel %vm381_vm6, %v1828_v23, %v1829_v22 }
 0x2b2   : > { %v1857_v60 = vpop.permute.xlu0 %1856  ;;  %v1847_v61 = vpop.permute.xlu1 %1846  ;;  %897 = vmatprep.subr.bf16.mxu0 %v865_v62  ;;  %v750_v44 = vsel %vm381_vm6, %v1834_v35, %v1828_v23  ;;  %v729_v49 = vsel %vm358_vm7, %v1843_v33, %v1844_v5 }
 0x2b3   : > { %v1859_v63 = vunpack.i.h.bf16 %v1857_v60  ;;  %v1858_v8 = vunpack.i.l.bf16 %v1857_v60  ;;  %v1849_v11 = vunpack.i.h.bf16 %v1847_v61  ;;  %v1848_v16 = vunpack.i.l.bf16 %v1847_v61  ;;  %939 = vmatpush1.bf16.msra.mxu1 %v866_v55 }
 0x2b4   : > { %940 = vmatprep.subr.bf16.mxu1 %v2135_v6 }
 0x2b5   : > { %v863_v24 = vpack.c.bf16 %v1804_v50, %v1849_v11  ;;  %v770_v25 = vsel %vm404_vm5, %v1818_v59, %v1848_v16  ;;  %v771_v29 = vsel %vm404_vm5, %v1848_v16, %v1849_v11  ;;  %898 = vmatpush1.bf16.msra.mxu0 %v864_v21  ;;  %v749_v9 = vsel %vm381_vm6, %v1858_v8, %v1859_v63 }
 0x2b6   : > { %v1872_v27 = vpop.permute.xlu0 %1871  ;;  %v1852_v10 = vpop.permute.xlu1 %1851  ;;  %v861_v31 = vpack.c.bf16 %v772_v26, %v770_v25  ;;  %v862_v7 = vpack.c.bf16 %v773_v32, %v771_v29  ;;  %v748_v36 = vsel %vm381_vm6, %v1833_v30, %v1858_v8  ;;  %v860_v37 = vpack.c.bf16 %v1829_v22, %v1859_v63 }
 0x2b7   : > { %941 = vmatpush1.bf16.msra.mxu1 %v863_v24  ;;  %v1854_v34 = vunpack.i.h.bf16 %v1852_v10  ;;  %v859_v41 = vpack.c.bf16 %v751_v38, %v749_v9  ;;  %v1853_v45 = vunpack.i.l.bf16 %v1852_v10  ;;  %v858_v47 = vpack.c.bf16 %v750_v44, %v748_v36 }
 0x2b8   : > { %942 = vmatprep.subr.bf16.mxu1 %v2135_v6  ;;  %899 = vmatprep.subr.bf16.mxu0 %v862_v7  ;;  %v1874_v55 = vunpack.i.h.bf16 %v1872_v27  ;;  %v1873_v8 = vunpack.i.l.bf16 %v1872_v27  ;;  %v848_v38 = vpack.c.bf16 %v2288_v3, %v2455_v18 }
 0x2b9   : > { %900 = vmatpush1.bf16.msra.mxu0 %v861_v31  ;;  %v728_v12 = vsel %vm358_vm7, %v1854_v34, %v1843_v33 }
 0x2ba   : > { %v1877_v39 = vpop.permute.xlu0 %1876  ;;  %v1862_v40 = vpop.permute.xlu1 %1861  ;;  %901 = vmatprep.subr.bf16.mxu0 %v859_v41 }
 0x2bb   : > { %v1864_v42 = vunpack.i.h.bf16 %v1862_v40  ;;  %v1863_v46 = vunpack.i.l.bf16 %v1862_v40  ;;  %943 = vmatpush1.bf16.msra.mxu1 %v860_v37  ;;  %v1879_v28 = vunpack.i.h.bf16 %v1877_v39  ;;  %v1878_v50 = vunpack.i.l.bf16 %v1877_v39 }
 0x2bc   : > { %944 = vmatprep.subr.bf16.mxu1 %v2135_v6 }
 0x2bd   : > { %v857_v51 = vpack.c.bf16 %v1844_v5, %v1864_v42  ;;  %v726_v52 = vsel %vm358_vm7, %v1853_v45, %v1863_v46  ;;  %v727_v53 = vsel %vm358_vm7, %v1863_v46, %v1864_v42  ;;  %902 = vmatpush1.bf16.msra.mxu0 %v858_v47  ;;  %v705_v21 = vsel %vm335_vm8, %v1878_v50, %v1879_v28 }
 0x2be   : > { %v855_v56 = vpack.c.bf16 %v728_v12, %v726_v52  ;;  %v1882_v57 = vpop.permute.xlu0 %1881  ;;  %v1867_v58 = vpop.permute.xlu1 %1866  ;;  %v856_v59 = vpack.c.bf16 %v729_v49, %v727_v53  ;;  %v704_v23 = vsel %vm335_vm8, %v1873_v8, %v1878_v50  ;;  %v847_v42 = vpack.c.bf16 %v2132_v0, %v2453_v17 }
 0x2bf   : > { %v1884_v60 = vunpack.i.h.bf16 %v1882_v57  ;;  %v1883_v61 = vunpack.i.l.bf16 %v1882_v57  ;;  %v1869_v62 = vunpack.i.h.bf16 %v1867_v58  ;;  %v1868_v63 = vunpack.i.l.bf16 %v1867_v58  ;;  %945 = vmatpush1.bf16.msra.mxu1 %v857_v51 }
 0x2c0   : > { %903 = vmatprep.subr.bf16.mxu0 %v856_v59  ;;  %946 = vmatprep.subr.bf16.mxu1 %v2135_v6  ;;  %v846_v49 = vpack.c.bf16 %v2132_v0, %v2447_v15 }
 0x2c1   : > { %v854_v11 = vpack.c.bf16 %v1869_v62, %v1879_v28  ;;  %v706_v16 = vsel %vm335_vm8, %v1874_v55, %v1868_v63  ;;  %v707_v22 = vsel %vm335_vm8, %v1868_v63, %v1869_v62  ;;  %904 = vmatpush1.bf16.msra.mxu0 %v855_v56  ;;  %v685_v27 = vsel %vm312_vm9, %v1883_v61, %v1884_v60 }
 0x2c2   : > { %v1887_v24 = vpop.permute.xlu1 %1886  ;;  %v853_v25 = vpack.c.bf16 %v707_v22, %v705_v21  ;;  %v852_v26 = vpack.c.bf16 %v706_v16, %v704_v23  ;;  %v1902_v30 = vpop.permute.xlu0 %1901 }
 0x2c3   : > { %v1889_v10 = vunpack.i.h.bf16 %v1887_v24  ;;  %v1888_v29 = vunpack.i.l.bf16 %v1887_v24  ;;  %947 = vmatpush1.bf16.msra.mxu1 %v854_v11  ;;  %v1904_v7 = vunpack.i.h.bf16 %v1902_v30  ;;  %v1903_v35 = vunpack.i.l.bf16 %v1902_v30 }
 0x2c4   : > { %905 = vmatprep.subr.bf16.mxu0 %v853_v25  ;;  %948 = vmatprep.subr.bf16.mxu1 %v2135_v6 }
 0x2c5   : > { %v851_v31 = vpack.c.bf16 %v1884_v60, %v1889_v10  ;;  %v683_v32 = vsel %vm312_vm9, %v1888_v29, %v1889_v10  ;;  %906 = vmatpush1.bf16.msra.mxu0 %v852_v26  ;;  %v837_v46 = vsel %vm473_vm10, %v1903_v35, %v1904_v7 }
 0x2c6   : > { %v1892_v9 = vpop.permute.xlu1 %1891  ;;  %v850_v5 = vpack.c.bf16 %v685_v27, %v683_v32  ;;  %v1907_v39 = vpop.permute.xlu0 %1906 }
 0x2c7   : > { %v1894_v33 = vunpack.i.h.bf16 %v1892_v9  ;;  %v1893_v34 = vunpack.i.l.bf16 %v1892_v9  ;;  %949 = vmatpush1.bf16.msra.mxu1 %v851_v31  ;;  %v1909_v47 = vunpack.i.h.bf16 %v1907_v39  ;;  %v1908_v12 = vunpack.i.l.bf16 %v1907_v39 }
 0x2c8   : > { %907 = vmatprep.subr.bf16.mxu0 %v850_v5  ;;  %950 = vmatprep.subr.bf16.mxu1 %v2135_v6 }
 0x2c9   : > { %v684_v36 = vsel %vm312_vm9, %v1894_v33, %v1883_v61  ;;  %v682_v37 = vsel %vm312_vm9, %v1893_v34, %v1888_v29  ;;  %v836_v52 = vsel %vm473_vm10, %v1908_v12, %v1903_v35  ;;  %v2624_v34 = vld.sshfl [vmem:[%s2782_s2 + $0x8] sm:$0x33 pattern:$0x76325410] }
 0x2ca   : > { %v849_v40 = vpack.c.bf16 %v684_v36, %v682_v37  ;;  %v1897_v41 = vpop.permute.xlu1 %1896  ;;  %v1590_v35 = vld [vmem:[%s2783_s3 + $0x8] sm:$0xf] }
 0x2cb   : > { %v1899_v44 = vunpack.i.h.bf16 %v1897_v41  ;;  %v1898_v45 = vunpack.i.l.bf16 %v1897_v41  ;;  %951 = vmatpush1.bf16.msra.mxu1 %v848_v38 }
 0x2cc   : > { %908 = vmatpush1.bf16.msra.mxu0 %v849_v40  ;;  %966 = vmatprep.subr.bf16.mxu1 %v2135_v6 }
 0x2cd   : > { %v872_v28 = vpack.c.bf16 %v1899_v44, %v1904_v7  ;;  %909 = vmatprep.subr.bf16.mxu0 %v847_v42  ;;  %v839_v3 = vsel %vm473_vm10, %v1898_v45, %v1899_v44  ;;  %v838_v51 = vsel %vm473_vm10, %v1909_v47, %v1898_v45  ;;  %v1233_v7 = vcombine.high %v2624_v34, %v2624_v34 }
 0x2ce   : > { %v871_v50 = vpack.c.bf16 %v839_v3, %v837_v46  ;;  %v870_v53 = vpack.c.bf16 %v838_v51, %v836_v52 }
 0x2cf   : > { %967 = vmatpush2.bf16.msra.mxu1 %v872_v28 }
 0x2d0   : > { %910 = vmatpush1.bf16.msra.mxu0 %v846_v49  ;;  %1279 = vmatprep.subr.bf16.mxu1 %v2135_v6 }
 0x2d1   : > { %925 = vmatprep.subr.bf16.mxu0 %v871_v50 }
 0x2d2   : > { %969 = vmatmul.mubr.bf16.vlgmr.msra.gmra.mxu1 %v2494_v20 }
 0x2d3   : > { %1593 = vmatprep.mubr.msk.bf16.mxu1 %vm528_vm2, %v1233_v7 }
 0x2d4   : > { %926 = vmatpush2.bf16.msra.mxu0 %v870_v53 }
 0x2d7   : > { %928 = vmatmul.mubr.bf16.vlgmr.msra.gmra.mxu0 %v2494_v20  ;;  %v880_v57 = vpop.permute.xlu1 %879 }
 0x2d8   : > { %1592 = vmatprep.mubr.msk.bf16.mxu0 %vm528_vm2, %v1233_v7 }
 0x392   : > { %v970_v55 = vpop.f32.mrf.mxu1 }
 0x393   : > { %v971_v61 = vadd.f32 %v970_v55, %v880_v57 }
 0x394   : > { %v972_v56 = vpop.f32.mrf.mxu1 }
 0x395   : > { %v978_v22 = vmax.f32 %v971_v61, 0.0 }
 0x396   : > { %v973_v58 = vpop.f32.mrf.mxu1 }
 0x397   : > { %v929_v59 = vpop.f32.mrf.mxu0  ;;  %v981_v20 = vmul.f32 %v978_v22, %v2417_v43 }
 0x398   : > { %v930_v60 = vadd.f32 %v929_v59, %v880_v57  ;;  %v974_v62 = vpop.f32.mrf.mxu1 }
 0x399   : > { %v931_v63 = vpop.f32.mrf.mxu0 }
 0x39a   : > { %v976_v8 = vmax.f32 %v930_v60, 0.0  ;;  %v932_v11 = vadd.f32 %v931_v63, %v880_v57 }
 0x39b   : > { %v933_v16 = vpop.f32.mrf.mxu0 }
 0x39c   : > { %v979_v21 = vmul.f32 %v976_v8, %v2419_v48  ;;  %v977_v23 = vmax.f32 %v932_v11, 0.0 }
 0x39d   : > { %v934_v24 = vpop.f32.mrf.mxu0 }
 0x39e   : > { %v980_v25 = vmul.f32 %v977_v23, %v2422_v54  ;;  %985 = vrot.lane.b32.xlu0 %v979_v21, %s2142_s17 }
 0x3a0   : > { %987 = vrot.lane.b32.xlu1 %v980_v25, %s2142_s17 }
 0x3a2   : > { %989 = vrot.lane.b32.xlu0 %v981_v20, %s2142_s17 }
 0x3a4   : > { %1912 = vrot.lane.b32.xlu1 %v2461_v19, %s2133_s7 }
 0x3a6   : > { %1917 = vrot.lane.b32.xlu0 %v2461_v19, %s2136_s16 }
 0x3a8   : > { %1922 = vrot.lane.b32.xlu1 %v2461_v19, %s2134_s15 }
 0x3aa   : > { %1927 = vrot.lane.b32.xlu0 %v2461_v19, %s2137_s18 }
 0x410   : > { %v2580_v26 = vpop.permute.xlu0 %985 }
 0x411   : > { %997 = vst.msk [vmem:[#allocation2 + $0x18] sm:$0xf] %vm996_vm14, %v2580_v26 }
 0x412   : > { %v988_v10 = vpop.permute.xlu1 %987 }
 0x413   : > { %v2585_v29 = vsel %vm647_vm12, %v2580_v26, %v988_v10 }
 0x414   : > { %998 = vst [vmem:[#allocation2 + $0x20] sm:$0xf] %v2585_v29  ;;  %v990_v27 = vpop.permute.xlu0 %989 }
 0x415   : > { %v2589_v30 = vsel %vm647_vm12, %v988_v10, %v990_v27 }
 0x416   : > { %1000 = vst.msk [vmem:[#allocation2 + $0x28] sm:$0xf] %vm999_vm15, %v2589_v30  ;;  %v1913_v36 = vpop.permute.xlu1 %1912 }
 0x417   : > { %v1915_v44 = vunpack.i.h.bf16 %v1913_v36 }
 0x418   : > { %v2592_v31 = vld [vmem:[#allocation2 + $0x18] sm:$0xff]  ;;  %v1918_v37 = vpop.permute.xlu0 %1917 }
 0x419   : > { %v1936_v32 = vpack.i.bf16 %v2592_v31, %v2447_v15  ;;  %v1920_v46 = vunpack.i.h.bf16 %v1918_v37  ;;  %v1919_v12 = vunpack.i.l.bf16 %v1918_v37 }
 0x41a   : > { %v1923_v38 = vpop.permute.xlu1 %1922 }
 0x41b   : > { %1937 = vrot.lane.b32.xlu0 %v1936_v32, %s2136_s16  ;;  %1932 = vrot.lane.b32.xlu1 %v1936_v32, %s2133_s7  ;;  %v2598_v9 = vld [vmem:[#allocation2 + $0x20] sm:$0xff]  ;;  %v1925_v8 = vunpack.i.h.bf16 %v1923_v38  ;;  %v1924_v11 = vunpack.i.l.bf16 %v1923_v38  ;;  %v1136_v16 = vsel %vm427_vm4, %v1919_v12, %v1920_v46 }
 0x41c   : > { %v2638_v39 = vpop.permute.xlu0 %1927 }
 0x41d   : > { %v2600_v5 = vld [vmem:[#allocation2 + $0x28] sm:$0xff]  ;;  %v1930_v10 = vunpack.i.h.bf16 %v2638_v39  ;;  %v1929_v27 = vunpack.i.l.bf16 %v2638_v39 }
 0x41e   : > { %v1946_v33 = vpack.i.bf16 %v2600_v5, %v2598_v9 }
 0x41f   : > { %1942 = vrot.lane.b32.xlu1 %v1936_v32, %s2134_s15 }
 0x420   : > { %1947 = vrot.lane.b32.xlu0 %v1946_v33, %s2133_s7 }
 0x423   : > { %1957 = vrot.lane.b32.xlu1 %v1946_v33, %s2136_s16 }
 0x424   : > { %1952 = vrot.lane.b32.xlu0 %v1936_v32, %s2137_s18 }
 0x427   : > { %1962 = vrot.lane.b32.xlu1 %v2461_v19, %s2138_s19 }
 0x428   : > { %1967 = vrot.lane.b32.xlu0 %v1946_v33, %s2134_s15  ;;  %s2144_s15 = smov [#allocation6]  }
 0x429   : > { %s2069_s16 = sshll.u32 %s2144_s15, 4  ;;  %s2070_s16 = int_to_ptr.vmem [resolvable:$false] %s2069_s16 }
 0x42b   : > { %1972 = vrot.lane.b32.xlu1 %v1946_v33, %s2137_s18 }
 0x42c   : > { %1982 = vrot.lane.b32.xlu0 %v2461_v19, %s2139_s11 }
 0x42f   : > { %1977 = vrot.lane.b32.xlu1 %v1936_v32, %s2138_s19 }
 0x430   : > { %1987 = vrot.lane.b32.xlu0 %v1946_v33, %s2138_s19 }
 0x433   : > { %1997 = vrot.lane.b32.xlu1 %v1946_v33, %s2139_s11 }
 0x434   : > { %1992 = vrot.lane.b32.xlu0 %v1936_v32, %s2139_s11 }
 0x437   : > { %2002 = vrot.lane.b32.xlu1 %v2461_v19, %s2140_s13 }
 0x438   : > { %2007 = vrot.lane.b32.xlu0 %v1946_v33, %s2140_s13 }
 0x43b   : > { %2012 = vrot.lane.b32.xlu1 %v1936_v32, %s2140_s13 }
 0x43c   : > { %2017 = vrot.lane.b32.xlu0 %v2461_v19, %s2141_s14  ;;  %v1914_v19 = vunpack.i.l.bf16 %v1913_v36 }
 0x43e   : > { %v1158_v52 = vsel %vm450_vm3, %v1914_v19, %v1915_v44 }
 0x43f   : > { %2022 = vrot.lane.b32.xlu1 %v1946_v33, %s2141_s14 }
 0x440   : > { %2027 = vrot.lane.b32.xlu0 %v1936_v32, %s2141_s14  ;;  %s1610_s14 = smul.u32 192, %s2201_s25  ;;  %s1492_s25 = scalar_lea.sflag [#allocation5], %s2266_s20 }
 0x442   : > { %s2742_s7 = scalar_lea.hbm %s2786_s6, %s1610_s14 }
 0x443   : > { %1222 = vperm.xlu1 %1910, %v1590_v35  }
 0x48d   : > { %v1933_v40 = vpop.permute.xlu1 %1932  ;;  %v1938_v41 = vpop.permute.xlu0 %1937 }
 0x48e   : > { %v1934_v45 = vunpack.i.l.bf16 %v1933_v40  ;;  %v1935_v28 = vunpack.i.h.bf16 %v1933_v40  ;;  %v1940_v50 = vunpack.i.h.bf16 %v1938_v41  ;;  %v1939_v51 = vunpack.i.l.bf16 %v1938_v41 }
 0x48f   : > { %v1114_v41 = vsel %vm404_vm5, %v1924_v11, %v1925_v8 }
 0x490   : > { %v1157_v53 = vsel %vm450_vm3, %v1934_v45, %v1914_v19  ;;  %v1135_v32 = vsel %vm427_vm4, %v1939_v51, %v1919_v12 }
 0x491   : > { %v1943_v42 = vpop.permute.xlu1 %1942 }
 0x492   : > { %v1948_v47 = vpop.permute.xlu0 %1947  ;;  %v1944_v21 = vunpack.i.l.bf16 %v1943_v42  ;;  %v1945_v7 = vunpack.i.h.bf16 %v1943_v42 }
 0x493   : > { %v1950_v3 = vunpack.i.h.bf16 %v1948_v47  ;;  %v1949_v49 = vunpack.i.l.bf16 %v1948_v47 }
 0x494   : > { %v1113_v38 = vsel %vm404_vm5, %v1944_v21, %v1924_v11 }
 0x495   : > { %v1212_v55 = vpack.c.bf16 %v1950_v3, %v1915_v44  ;;  %v1159_v56 = vsel %vm450_vm3, %v1935_v28, %v1949_v49  ;;  %v1958_v57 = vpop.permute.xlu1 %1957  ;;  %v1160_v58 = vsel %vm450_vm3, %v1949_v49, %v1950_v3  ;;  %v1092_v49 = vsel %vm381_vm6, %v1929_v27, %v1930_v10 }
 0x496   : > { %v1210_v59 = vpack.c.bf16 %v1159_v56, %v1157_v53  ;;  %v1960_v60 = vunpack.i.h.bf16 %v1958_v57  ;;  %v1959_v61 = vunpack.i.l.bf16 %v1958_v57  ;;  %v1953_v62 = vpop.permute.xlu0 %1952  ;;  %v1211_v63 = vpack.c.bf16 %v1160_v58, %v1158_v52 }
 0x497   : > { %1280 = vmatpush1.bf16.msra.mxu1 %v1212_v55  ;;  %v1955_v40 = vunpack.i.h.bf16 %v1953_v62  ;;  %v1954_v44 = vunpack.i.l.bf16 %v1953_v62 }
 0x498   : > { %v1137_v22 = vsel %vm427_vm4, %v1940_v50, %v1959_v61  ;;  %v1209_v23 = vpack.c.bf16 %v1960_v60, %v1920_v46  ;;  %1238 = vmatprep.subr.bf16.mxu0 %v1211_v63  ;;  %1281 = vmatprep.subr.bf16.mxu1 %v2135_v6  ;;  %v1138_v24 = vsel %vm427_vm4, %v1959_v61, %v1960_v60 }
 0x499   : > { %v1963_v25 = vpop.permute.xlu1 %1962  ;;  %1239 = vmatpush1.bf16.msra.mxu0 %v1210_v59  ;;  %v1208_v20 = vpack.c.bf16 %v1138_v24, %v1136_v16  ;;  %v1207_v35 = vpack.c.bf16 %v1137_v22, %v1135_v32  ;;  %v1091_v58 = vsel %vm381_vm6, %v1954_v44, %v1929_v27 }
 0x49a   : > { %v1968_v33 = vpop.permute.xlu0 %1967  ;;  %v1965_v53 = vunpack.i.h.bf16 %v1963_v25  ;;  %v1964_v55 = vunpack.i.l.bf16 %v1963_v25 }
 0x49b   : > { %v1970_v36 = vunpack.i.h.bf16 %v1968_v33  ;;  %v1969_v37 = vunpack.i.l.bf16 %v1968_v33  ;;  %1240 = vmatprep.subr.bf16.mxu0 %v1208_v20  ;;  %1282 = vmatpush1.bf16.msra.mxu1 %v1209_v23 }
 0x49c   : > { %1283 = vmatprep.subr.bf16.mxu1 %v2135_v6  ;;  %v1070_v25 = vsel %vm358_vm7, %v1964_v55, %v1965_v53 }
 0x49d   : > { %v1206_v19 = vpack.c.bf16 %v1970_v36, %v1925_v8  ;;  %v1115_v39 = vsel %vm404_vm5, %v1945_v7, %v1969_v37  ;;  %v1973_v45 = vpop.permute.xlu1 %1972  ;;  %1241 = vmatpush1.bf16.msra.mxu0 %v1207_v35  ;;  %v1116_v42 = vsel %vm404_vm5, %v1969_v37, %v1970_v36 }
 0x49e   : > { %v1204_v46 = vpack.c.bf16 %v1115_v39, %v1113_v38  ;;  %v1975_v47 = vunpack.i.h.bf16 %v1973_v45  ;;  %v1974_v12 = vunpack.i.l.bf16 %v1973_v45  ;;  %v1983_v28 = vpop.permute.xlu0 %1982  ;;  %v1205_v3 = vpack.c.bf16 %v1116_v42, %v1114_v41 }
 0x49f   : > { %1284 = vmatpush1.bf16.msra.mxu1 %v1206_v19  ;;  %v1985_v11 = vunpack.i.h.bf16 %v1983_v28  ;;  %v1984_v16 = vunpack.i.l.bf16 %v1983_v28 }
 0x4a0   : > { %v1093_v50 = vsel %vm381_vm6, %v1955_v40, %v1974_v12  ;;  %v1203_v51 = vpack.c.bf16 %v1975_v47, %v1930_v10  ;;  %1242 = vmatprep.subr.bf16.mxu0 %v1205_v3  ;;  %1285 = vmatprep.subr.bf16.mxu1 %v2135_v6  ;;  %v1094_v52 = vsel %vm381_vm6, %v1974_v12, %v1975_v47 }
 0x4a1   : > { %v1978_v56 = vpop.permute.xlu1 %1977  ;;  %1243 = vmatpush1.bf16.msra.mxu0 %v1204_v46  ;;  %v1202_v57 = vpack.c.bf16 %v1094_v52, %v1092_v49  ;;  %v1201_v62 = vpack.c.bf16 %v1093_v50, %v1091_v58  ;;  %v1048_v38 = vsel %vm335_vm8, %v1984_v16, %v1985_v11 }
 0x4a2   : > { %v1980_v59 = vunpack.i.h.bf16 %v1978_v56  ;;  %v1979_v60 = vunpack.i.l.bf16 %v1978_v56  ;;  %v1988_v61 = vpop.permute.xlu0 %1987 }
 0x4a3   : > { %v1990_v63 = vunpack.i.h.bf16 %v1988_v61  ;;  %v1989_v8 = vunpack.i.l.bf16 %v1988_v61  ;;  %1244 = vmatprep.subr.bf16.mxu0 %v1202_v57  ;;  %1286 = vmatpush1.bf16.msra.mxu1 %v1203_v51 }
 0x4a4   : > { %v1069_v21 = vsel %vm358_vm7, %v1979_v60, %v1964_v55  ;;  %1287 = vmatprep.subr.bf16.mxu1 %v2135_v6 }
 0x4a5   : > { %v1200_v22 = vpack.c.bf16 %v1990_v63, %v1965_v53  ;;  %v1071_v23 = vsel %vm358_vm7, %v1980_v59, %v1989_v8  ;;  %v1998_v24 = vpop.permute.xlu1 %1997  ;;  %1245 = vmatpush1.bf16.msra.mxu0 %v1201_v62  ;;  %v1072_v20 = vsel %vm358_vm7, %v1989_v8, %v1990_v63  ;;  %v1191_v63 = vpack.c.bf16 %v2600_v5, %v2455_v18 }
 0x4a6   : > { %v1198_v10 = vpack.c.bf16 %v1071_v23, %v1069_v21  ;;  %v2000_v27 = vunpack.i.h.bf16 %v1998_v24  ;;  %v1999_v32 = vunpack.i.l.bf16 %v1998_v24  ;;  %v1993_v33 = vpop.permute.xlu0 %1992  ;;  %v1199_v7 = vpack.c.bf16 %v1072_v20, %v1070_v25 }
 0x4a7   : > { %v1995_v35 = vunpack.i.h.bf16 %v1993_v33  ;;  %v1994_v36 = vunpack.i.l.bf16 %v1993_v33  ;;  %1288 = vmatpush1.bf16.msra.mxu1 %v1200_v22  ;;  %v1190_v21 = vpack.c.bf16 %v2598_v9, %v2453_v17  ;;  %v1189_v18 = vpack.c.bf16 %v2592_v31, %v2447_v15 }
 0x4a8   : > { %v1197_v37 = vpack.c.bf16 %v2000_v27, %v1985_v11  ;;  %1246 = vmatprep.subr.bf16.mxu0 %v1199_v7  ;;  %1289 = vmatprep.subr.bf16.mxu1 %v2135_v6  ;;  %v1050_v40 = vsel %vm335_vm8, %v1999_v32, %v2000_v27 }
 0x4a9   : > { %v1049_v41 = vsel %vm335_vm8, %v1995_v35, %v1999_v32  ;;  %v1047_v44 = vsel %vm335_vm8, %v1994_v36, %v1984_v16  ;;  %v2003_v19 = vpop.permute.xlu1 %2002  ;;  %1247 = vmatpush1.bf16.msra.mxu0 %v1198_v10  ;;  %v1196_v39 = vpack.c.bf16 %v1050_v40, %v1048_v38 }
 0x4aa   : > { %v1195_v45 = vpack.c.bf16 %v1049_v41, %v1047_v44  ;;  %v2005_v42 = vunpack.i.h.bf16 %v2003_v19  ;;  %v2004_v46 = vunpack.i.l.bf16 %v2003_v19  ;;  %v2008_v47 = vpop.permute.xlu0 %2007 }
 0x4ab   : > { %v2010_v12 = vunpack.i.h.bf16 %v2008_v47  ;;  %v2009_v28 = vunpack.i.l.bf16 %v2008_v47  ;;  %1248 = vmatprep.subr.bf16.mxu0 %v1196_v39  ;;  %1290 = vmatpush1.bf16.msra.mxu1 %v1197_v37 }
 0x4ac   : > { %1291 = vmatprep.subr.bf16.mxu1 %v2135_v6  ;;  %v1026_v3 = vsel %vm312_vm9, %v2004_v46, %v2005_v42 }
 0x4ad   : > { %v1194_v49 = vpack.c.bf16 %v2010_v12, %v2005_v42  ;;  %v2013_v50 = vpop.permute.xlu1 %2012  ;;  %1249 = vmatpush1.bf16.msra.mxu0 %v1195_v45  ;;  %v1028_v51 = vsel %vm312_vm9, %v2009_v28, %v2010_v12 }
 0x4ae   : > { %v2015_v52 = vunpack.i.h.bf16 %v2013_v50  ;;  %v2014_v53 = vunpack.i.l.bf16 %v2013_v50  ;;  %v2018_v55 = vpop.permute.xlu0 %2017  ;;  %v1193_v56 = vpack.c.bf16 %v1028_v51, %v1026_v3 }
 0x4af   : > { %1292 = vmatpush1.bf16.msra.mxu1 %v1194_v49  ;;  %v2020_v59 = vunpack.i.h.bf16 %v2018_v55  ;;  %v2019_v60 = vunpack.i.l.bf16 %v2018_v55 }
 0x4b0   : > { %v1025_v57 = vsel %vm312_vm9, %v2014_v53, %v2004_v46  ;;  %v1027_v58 = vsel %vm312_vm9, %v2015_v52, %v2009_v28  ;;  %1250 = vmatprep.subr.bf16.mxu0 %v1193_v56  ;;  %1293 = vmatprep.subr.bf16.mxu1 %v2135_v6  ;;  %v287_v28 = vld [vmem:[%s2272_s29 + $0x8] sm:$0xf]  ;;  %s2071_s29 = scalar_lea.vmem %s2070_s16, 384 }
 0x4b1   : > { %v1192_v61 = vpack.c.bf16 %v1027_v58, %v1025_v57  ;;  %v2023_v62 = vpop.permute.xlu1 %2022  ;;  %v1180_v25 = vsel %vm473_vm10, %v2019_v60, %v2020_v59  ;;  %v1348_v52 = vsel %vm1345_vm1, %v287_v28, %v2443_v14  ;;  %v1355_v58 = vld [vmem:[%s2784_s4] sm:$0x3] }
 0x4b2   : > { %v2025_v8 = vunpack.i.h.bf16 %v2023_v62  ;;  %v2024_v11 = vunpack.i.l.bf16 %v2023_v62  ;;  %v2028_v16 = vpop.permute.xlu0 %2027 }
 0x4b3   : > { %v2030_v22 = vunpack.i.h.bf16 %v2028_v16  ;;  %v2029_v23 = vunpack.i.l.bf16 %v2028_v16  ;;  %1251 = vmatpush1.bf16.msra.mxu0 %v1192_v61  ;;  %1294 = vmatpush1.bf16.msra.mxu1 %v1191_v63 }
 0x4b4   : > { %v1215_v24 = vpack.c.bf16 %v2025_v8, %v2020_v59  ;;  %1252 = vmatprep.subr.bf16.mxu0 %v1190_v21  ;;  %1309 = vmatprep.subr.bf16.mxu1 %v2135_v6  ;;  %v1182_v20 = vsel %vm473_vm10, %v2024_v11, %v2025_v8 }
 0x4b5   : > { %v1214_v5 = vpack.c.bf16 %v1182_v20, %v1180_v25  ;;  %v1181_v10 = vsel %vm473_vm10, %v2030_v22, %v2024_v11  ;;  %v1179_v17 = vsel %vm473_vm10, %v2029_v23, %v2019_v60 }
 0x4b6   : > { %v1213_v9 = vpack.c.bf16 %v1181_v10, %v1179_v17 }
 0x4b7   : > { %1253 = vmatpush1.bf16.msra.mxu0 %v1189_v18  ;;  %1310 = vmatpush2.bf16.msra.mxu1 %v1215_v24 }
 0x4b8   : > { %1268 = vmatprep.subr.bf16.mxu0 %v1214_v5  ;;  %1601 = vmatprep.subr.bf16.mxu1 %v2132_v0 }
 0x4ba   : > { %1312 = vmatmul.mubr.bf16.vlgmr.msra.gmra.mxu1 %v2624_v34 }
 0x4bb   : > { %1269 = vmatpush2.bf16.msra.mxu0 %v1213_v9  ;;  %1603 = vmatprep.mubr.msk.bf16.mxu1 %vm2143_vm0, %v2132_v0 }
 0x4be   : > { %1271 = vmatmul.mubr.bf16.vlgmr.msra.gmra.mxu0 %v2624_v34  ;;  %v1223_v27 = vpop.permute.xlu1 %1222 }
 0x4bf   : > { %1412 = vmatprep.mubr.bf16.mxu0 %v2135_v6 }
 0x57a   : > { %v1313_v15 = vpop.f32.mrf.mxu1 }
 0x57b   : > { %v1314_v31 = vadd.f32 %v1313_v15, %v1223_v27 }
 0x57c   : > { %v1315_v32 = vpop.f32.mrf.mxu1 }
 0x57d   : > { %v1321_v33 = vmax.f32 %v1314_v31, 0.0 }
 0x57e   : > { %v1272_v7 = vpop.f32.mrf.mxu0  ;;  %v1316_v35 = vpop.f32.mrf.mxu1 }
 0x57f   : > { %v1324_v36 = vmul.f32 %v1321_v33, %v2417_v43  ;;  %v1273_v37 = vadd.f32 %v1272_v7, %v1223_v27 }
 0x580   : > { %v1274_v38 = vpop.f32.mrf.mxu0  ;;  %v1317_v40 = vpop.f32.mrf.mxu1 }
 0x581   : > { %v1333_v41 = vrot.slane %v1324_v36, 4  ;;  %v1319_v44 = vmax.f32 %v1273_v37, 0.0  ;;  %v1275_v19 = vadd.f32 %v1274_v38, %v1223_v27 }
 0x582   : > { %v1276_v39 = vpop.f32.mrf.mxu0 }
 0x583   : > { %v1322_v34 = vmul.f32 %v1319_v44, %v2419_v48  ;;  %v1320_v6 = vmax.f32 %v1275_v19, 0.0  ;;  %1338 = vrot.lane.b32.xlu1 %v1333_v41, %s2142_s17 }
 0x584   : > { %v1277_v45 = vpop.f32.mrf.mxu0 }
 0x585   : > { %v1323_v42 = vmul.f32 %v1320_v6, %v2422_v54  ;;  %v1331_v46 = vrot.slane %v1322_v34, 4  ;;  %v1347_v54 = vsel %vm1345_vm1, %v2292_v4, %v2440_v13  ;;  %v1346_v4 = vsel %vm1345_vm1, %v2285_v1, %v2435_v2  ;;  %v1356_v13 = vld [vmem:[%s2785_s5] sm:$0xf] }
 0x587   : > { %v1332_v47 = vrot.slane %v1323_v42, 4 }
 0x589   : > { %v2031_v12 = vpack.i.bf16 %v1332_v47, %v1331_v46 }
 0x58b   : > { %2032 = vrot.lane.b32.xlu0 %v2031_v12, %s2142_s17 }
 0x5f5   : > { %v1339_v50 = vpop.permute.xlu1 %1338 }
 0x5fd   : > { %v2033_v43 = vpop.permute.xlu0 %2032 }
 0x5fe   : > { %v2035_v3 = vunpack.i.h.bf16 %v2033_v43  ;;  %v2034_v49 = vunpack.i.l.bf16 %v2033_v43 }
 0x600   : > { %v1341_v48 = vsel %vm647_vm12, %v2035_v3, %v1339_v50  ;;  %v1340_v51 = vsel %vm647_vm12, %v2034_v49, %v2035_v3  ;;  %v1349_v57 = vsel %vm1345_vm1, %v2580_v26, %v2034_v49 }
 0x601   : > { %v1351_v0 = vsel %vm1345_vm1, %v2589_v30, %v1341_v48  ;;  %v1350_v53 = vsel %vm1345_vm1, %v2585_v29, %v1340_v51  ;;  %v1352_v14 = vpack.c.bf16 %v1349_v57, %v1346_v4 }
 0x602   : > { %v1354_v55 = vpack.c.bf16 %v1351_v0, %v1348_v52  ;;  %v1353_v56 = vpack.c.bf16 %v1350_v53, %v1347_v54 }
 0x604   : > { %1369 = vrot.lane.b32.xlu1 %v1354_v55, %s2137_s18  ;;  %1367 = vrot.lane.b32.xlu0 %v1353_v56, %s2137_s18 }
 0x608   : > { %1359 = vperm.xlu1 %1910, %v1356_v13   ;;  %1365 = vrot.lane.b32.xlu0 %v1352_v14, %s2137_s18 }
 0x676   : > { %v1370_v29 = vpop.permute.xlu1 %1369  ;;  %v1368_v30 = vpop.permute.xlu0 %1367 }
 0x677   : > { %1602 = vmatpush3.bf16.msra.mxu1 %v1370_v29  ;;  %v1373_v26 = vsel %vm381_vm6, %v1368_v30, %v1370_v29 }
 0x678   : > { %1394 = vmatprep.subr.bf16.mxu0 %v1373_v26 }
 0x67a   : > { %1604 = vmatmul.mubr.msk.bf16.vlgmr.msra.gmra.mxu1 %vm528_vm2, %v1355_v58  ;;  %v1366_v2 = vpop.permute.xlu0 %1365 }
 0x67b   : > { %v1372_v59 = vsel %vm381_vm6, %v1366_v2, %v1368_v30 }
 0x67c   : > { %1395 = vmatpush1.bf16.msra.mxu0 %v1372_v59 }
 0x67f   : > { %1594 = vmatmul.mubr.msk.bf16.vlgmr.msra.gmra.mxu0 %vm528_vm2, %v1355_v58  ;;  %vm1489_vm2 = vcmask 257024  }
 0x683   : > { %v1360_v60 = vpop.permute.xlu1 %1359 }
 0x73a   : > { %v1455_v61 = vpop.f32.mrf.mxu1 }
 0x73b   : > { %v1456_v62 = vadd.f32 %v1455_v61, %v1360_v60 }
 0x73c   : > { %v1605_v63 = vpop.f32.mrf.mxu1 }
 0x73d   : > { %1467 = vrot.lane.b32.xlu1 %v1456_v62, %s2142_s17 }
 0x73e   : > { %v1458_v8 = vpop.f32.mrf.mxu1 }
 0x73f   : > { %v1414_v11 = vpop.f32.mrf.mxu0 }
 0x740   : > { %v1606_v16 = vpop.f32.mrf.mxu1  ;;  %v1415_v22 = vadd.f32 %v1414_v11, %v1360_v60 }
 0x741   : > { %v1416_v21 = vpop.f32.mrf.mxu0 }
 0x742   : > { %v1417_v23 = vadd.f32 %v1416_v21, %v1360_v60 }
 0x743   : > { %v1418_v24 = vpop.f32.mrf.mxu0 }
 0x744   : > { %v1464_v25 = vcombine.low %v1415_v22, %v1417_v23 }
 0x745   : > { %v1419_v20 = vpop.f32.mrf.mxu0 }
 0x746   : > { %1465 = vrot.lane.b32.xlu0 %v1464_v25, %s2142_s17  ;;  %s2797_s17 = smul.u32 12, %s2266_s20 }
 0x748   : > { %s267_s28 = scalar_lea.vmem [#allocation6], %s2797_s17 }
 0x749   : > { %s1506_s12 = sshll.u32 %s267_s28, 4  ;;  %s1507_s12 = int_to_ptr.vmem [resolvable:$true] %s1506_s12 }
 0x74a   : > { %p2072_p1 = scmp.lt.s32.totalorder %s1507_s12, %s2070_s16 }
 0x7af   : > { %v1468_v10 = vpop.permute.xlu1 %1467 }
 0x7b8   : > { %v1466_v18 = vpop.permute.xlu0 %1465 }
 0x7b9   : > { %v1469_v5 = vrot.slane %v1466_v18, 4 }
 0x7bb   : > { %v1470_v17 = vsel %vm647_vm12, %v1469_v5, %v1466_v18  ;;  %v1471_v9 = vsel %vm647_vm12, %v1469_v5, %v1468_v10 }
 0x7bc   : > { %v1474_v27 = vadd.f32 %v1470_v17, %v2285_v1  ;;  %v1475_v15 = vadd.f32 %v1471_v9, %v287_v28 }
 0x7be   : > { %1480 = vrot.lane.b32.xlu1 %v1475_v15, %s2137_s18  ;;  %1478 = vrot.lane.b32.xlu0 %v1474_v27, %s2137_s18  ;;  %s2065_s18 = scalar_lea.vmem %s1507_s12, 192 }
 0x7bf   : > { %p2066_p11 = scmp.ne.s32.totalorder %s1507_s12, %s2065_s18  ;;  %p2073_p3 = scmp.lt.s32.totalorder %s2071_s29, %s2065_s18 }
 0x7c1   : > { %p2067_p13 = pnand %p2066_p11, %p2798_p12  ;;  %p2074_p8 = por %p2073_p3, %p2072_p1 }
 0x7c3   : > { %p2068_p0 = pneg %p2067_p13 }
 0x7c5   : > { %p2075_p10 = pnand %p2074_p8, %p2068_p0 }
 0x830   : > { %v1481_v31 = vpop.permute.xlu1 %1480  ;;  %v1479_v32 = vpop.permute.xlu0 %1478 }
 0x831   : > { %v1483_v33 = vrot.slane %v1481_v31, 4  ;;  %1490 = vst.msk [vmem:[%s267_s28 + $0x8] sm:$0xf] %vm1489_vm2, %v1481_v31  ;;  %v1482_v7 = vrot.slane %v1479_v32, 4 }
 0x833   : > { %v1484_v35 = vsel %vm1345_vm1, %v1482_v7, %v1483_v33 }
 0x834   : > { %v1485_v1 = vsel %vm381_vm6, %v1479_v32, %v1484_v35 }
 0x835   : > { %1488 = vst [vmem:[%s267_s28] sm:$0xff] %v1485_v1 }
 0x836   : > { %2078 = shalt.err (!%p2075_p10)
}
 0x837   : > { %s2079_s19 = scalar_lea.hbm %s2742_s7, 192  ;;  %s2083_s13 = scalar_lea.hbm %s2786_s6, 384 }
 0x838   : > { %p2080_p2 = scmp.ne.s32.totalorder %s2742_s7, %s2079_s19  ;;  %p2084_p7 = scmp.lt.s32.totalorder %s2742_s7, %s2786_s6 }
 0x839   : > { %p2085_p5 = scmp.lt.s32.totalorder %s2083_s13, %s2079_s19 }
 0x83a   : > { %p2081_p4 = pnand %p2080_p2, %p2798_p12 }
 0x83b   : > { %p2086_p6 = por %p2085_p5, %p2084_p7 }
 0x83c   : > { %p2082_p9 = pneg %p2081_p4 }
 0x83e   : > { %p2087_p11 = pnand %p2086_p6, %p2082_p9 }
 0x840   : > { %2090 = shalt.err (!%p2087_p11)
}
 0x841   : > { %1613 = dma.vmem_to_hbm [thread:$0]  (%p2798_p12), %s1507_s12, 192, %s2742_s7, %s1492_s25  }
 0x842 PF: > { %s1518_s28 = sand.u32 1, %s2117_s21   ;;  %p2799_p13 = scmp.ne.s32.totalorder %s2792_s9, 0 }
 0x843   : > { %p2800_p0 = scmp.ge.s32.totalorder %s2129_s24, 2  ;;  %s1519_s10 = scalar_lea.sflag [#allocation5], %s1518_s28 }
 0x845   : > { %p1620_p1 = pnand %p2800_p0, %p2799_p13 }
 0x847   : > { %p1621_p3 = pneg %p1620_p1 }
 0x849   : > { %2112 = dma.done.wait (%p1621_p3), %s1519_s10, 192  }
 0x84a   : > { %2114 = vsyncadd (%p1621_p3), %s1519_s10, 4294967104  ;;  %p19_p8 = scmp.ge.s32.totalorder %s2205_s27, 4   ;;  %s2801_s21 = smov %s2121_s22 }
 0x84b   : > { %s2802_s22 = smov %s2125_s23  ;;  %s2803_s23 = smov %s2217_s30 }
 0x84c   : > { %s2804_s24 = smov %s2205_s27  ;;  %21 = sbr.rel (!%p19_p8) target bundleno = 5 (0x5), region = 93 }
 0x851   :  { %1524 = vsyncpa [#allocation4], 1 }
 0x852   :  { %1526 = vsyncpa [#allocation4 + $0x1], 1 }
 0x853   :  { %1527 = vsyncpa [#allocation5], 1 }
 0x854   :  { %1529 = vsyncpa [#allocation5 + $0x1], 1 }

</bundles_post_ra>
